<compile_context>
chip_gen: v7x
topology: tpu7x:2x2x1
jax: 0.10.0
libtpu: 0.0.40
codegen_flags: <defaults>
</compile_context>

<pallas_src>
import jax
import jax.numpy as jnp
from jax.experimental import pallas as pl
from jax.experimental.pallas import tpu as pltpu

BN_EPS = 1e-5
H1 = 600          # logical hidden width of layer1
H1_PAD = 640      # padded to 5 * 128 lanes (lane-dense vregs; pad cols inert)
H2 = 1024         # already 8 * 128 lanes
DEFAULT_TILE_B = 256   # >=256 amortizes ~0.35us/step; multiple of 16 (bf16 LHS packing)


# ---------------------------------------------------------------------------
# shared math (pure jnp: usable both inside kernels and in host-side glue)
# ---------------------------------------------------------------------------

def _fold_bn_scale_shift(s1, s2, gamma, beta, inv_n, pre_scale):
    """Training-mode BatchNorm1d folded into one per-feature scale/shift.

    One-pass stats (sum / sum-of-squares), biased variance, eps=1e-5.
    `pre_scale` folds an extra affine constant (e.g. the sigmoid's inner 0.5)
    into the same scale/shift so it never touches the VALU per-element path.
    """
    mu = s1 * inv_n
    var = jnp.maximum(s2 * inv_n - mu * mu, 0.0)   # guard cancellation
    scale = (pre_scale * gamma) * jax.lax.rsqrt(var + BN_EPS)
    shift = pre_scale * beta - mu * scale
    return scale, shift


# ---------------------------------------------------------------------------
# VMEM budgeting (per-generation, derived from footprint)
# ---------------------------------------------------------------------------

def _vmem_capacity_bytes():
    try:
        return int(pltpu.get_tpu_info().vmem_capacity_bytes)
    except Exception:
        return 64 << 20   # conservative fallback (v7x per-TensorCore physical)


def _vmem_limit_bytes(footprint):
    # footprint + compiler-scratch headroom; floor at the 16 MiB v5e default,
    # cap at 3/4 physical (~48 MiB on v7x, ~96 MiB on v5e/v6e).
    want = int(footprint) + (4 << 20)
    return int(max(16 << 20, min(want, (_vmem_capacity_bytes() * 3) // 4)))


def _fused_footprint_bytes(b, nfeat, h1p, h2):
    weights = nfeat * h1p * 2 + h1p * h2 * 2 + 4 * h1p * 4 + 2 * h2 * 4
    per_row = 4 * nfeat + 4 * h1p + 2 * h1p + 4 * h2 + 4 * h2   # x, h, a, h2, out
    return weights + b * per_row


def _tiled_footprint_bytes(tb, nfeat, h1p, h2):
    # Phase B dominates: 2x h1 tile (bf16), 2x w2h, 2x h2 tile (f32), f32 scratch.
    return (2 * tb * h1p * 2 + 2 * h1p * h2 * 2 + 2 * tb * h2 * 4
            + tb * (4 * h1p + 4 * h2) + 2 * tb * nfeat * 4)


# ---------------------------------------------------------------------------
# fused single-block path (small / medium batches)
# ---------------------------------------------------------------------------

def _fused_kernel(x_ref, w1_ref, g1_ref, be1_ref, w2h_ref, g2_ref, be2_ref, o_ref):
    # Gridless call: this block IS the whole batch, so shape[0] == true B.
    # (The tiled path never uses a tile shape for this; its glue uses real B.)
    inv_b = 1.0 / x_ref.shape[0]

    # layer1: Linear (bias folded away by BN) -> BN -> sigmoid
    h = jnp.dot(x_ref[...].astype(jnp.bfloat16), w1_ref[...],
                preferred_element_type=jnp.float32)
    s1 = jnp.sum(h, axis=0, keepdims=True)
    s2 = jnp.sum(h * h, axis=0, keepdims=True)
    sc1, sh1 = _fold_bn_scale_shift(s1, s2, g1_ref[...], be1_ref[...], inv_b, 0.5)
    # sigmoid(z) = 0.5*tanh(0.5 z) + 0.5: the 0.5's live in sc1/sh1 and in the
    # pre-halved w2h; the '+0.5' is a per-feature constant into layer 2 that
    # BN2's mean subtraction cancels exactly -> bare EUP tanh here.
    a = jnp.tanh(h * sc1 + sh1)

    # layer2: Linear (bias folded away) -> BN -> ReLU
    h2 = jnp.dot(a.astype(jnp.bfloat16), w2h_ref[...],
                 preferred_element_type=jnp.float32)
    t1 = jnp.sum(h2, axis=0, keepdims=True)
    t2 = jnp.sum(h2 * h2, axis=0, keepdims=True)
    sc2, sh2 = _fold_bn_scale_shift(t1, t2, g2_ref[...], be2_ref[...], inv_b, 1.0)
    o_ref[...] = jnp.maximum(h2 * sc2 + sh2, 0.0).astype(o_ref.dtype)


def _fused_forward(x, params, vmem_limit):
    B = x.shape[0]
    h2 = params["w2h"].shape[1]
    vmem = pl.BlockSpec(memory_space=pltpu.MemorySpace.VMEM)
    return pl.pallas_call(
        _fused_kernel,
        out_shape=jax.ShapeDtypeStruct((B, h2), jnp.float32),
        in_specs=[vmem] * 7,
        out_specs=vmem,
        compiler_params=pltpu.CompilerParams(vmem_limit_bytes=vmem_limit),
    )(x, params["w1"], params["g1"], params["be1"],
      params["w2h"], params["g2"], params["be2"])


# ---------------------------------------------------------------------------
# batch-tiled path (two-pass BN per layer; 3 pallas_calls)
# ---------------------------------------------------------------------------

def _tiled_forward(x, params, tb, vmem_limit):
    B, nfeat = x.shape
    h1p = params["w1"].shape[1]
    h2 = params["w2h"].shape[1]
    n_tiles = -(-B // tb)
    b_pad = n_tiles * tb
    # Zero-padded batch rows stay exactly zero through the bias-free layer-1
    # matmul, so layer-1 stats need no masking; layer-2 stats are masked in the
    # kernel because tanh(shift1) != 0 on the pad rows.
    x_pad = jnp.pad(x, ((0, b_pad - B), (0, 0))) if b_pad != B else x
    ragged = b_pad != B
    inv_b = jnp.float32(1.0 / B)   # true batch size, NOT the tile size

    # ---- phase A: h1 = x @ w1 (bf16 spill) + layer-1 sum / sum-sq ----
    def phase_a(x_ref, w1_ref, h1_ref, s1_ref, s2_ref):
        @pl.when(pl.program_id(0) == 0)
        def _():
            s1_ref[...] = jnp.zeros_like(s1_ref)
            s2_ref[...] = jnp.zeros_like(s2_ref)
        h = jnp.dot(x_ref[...].astype(jnp.bfloat16), w1_ref[...],
                    preferred_element_type=jnp.float32)
        s1_ref[...] += jnp.sum(h, axis=0, keepdims=True)
        s2_ref[...] += jnp.sum(h * h, axis=0, keepdims=True)
        h1_ref[...] = h.astype(h1_ref.dtype)

    h1, a_s1, a_s2 = pl.pallas_call(
        phase_a,
        grid=(n_tiles,),
        in_specs=[pl.BlockSpec((tb, nfeat), lambda i: (i, 0)),
                  pl.BlockSpec((nfeat, h1p), lambda i: (0, 0))],   # weight resident
        out_specs=[pl.BlockSpec((tb, h1p), lambda i: (i, 0)),
                   pl.BlockSpec((1, h1p), lambda i: (0, 0)),
                   pl.BlockSpec((1, h1p), lambda i: (0, 0))],
        out_shape=(jax.ShapeDtypeStruct((b_pad, h1p), jnp.bfloat16),
                   jax.ShapeDtypeStruct((1, h1p), jnp.float32),
                   jax.ShapeDtypeStruct((1, h1p), jnp.float32)),
        compiler_params=pltpu.CompilerParams(
            dimension_semantics=("arbitrary",),   # stats accumulators live across tiles
            vmem_limit_bytes=vmem_limit),
    )(x_pad, params["w1"])

    sc1, sh1 = _fold_bn_scale_shift(a_s1, a_s2, params["g1"], params["be1"],
                                    inv_b, 0.5)

    # ---- phase B: a = tanh(BN1(h1)); h2 = a @ w2h + layer-2 stats ----
    def phase_b(h1_ref, sc_ref, sh_ref, w2_ref, h2_ref, s1_ref, s2_ref):
        @pl.when(pl.program_id(0) == 0)
        def _():
            s1_ref[...] = jnp.zeros_like(s1_ref)
            s2_ref[...] = jnp.zeros_like(s2_ref)
        z = h1_ref[...].astype(jnp.float32) * sc_ref[...] + sh_ref[...]
        a = jnp.tanh(z)
        h2t = jnp.dot(a.astype(jnp.bfloat16), w2_ref[...],
                      preferred_element_type=jnp.float32)
        h2_ref[...] = h2t
        if ragged:   # keep pad rows out of the batch statistics
            rows = (pl.program_id(0) * tb
                    + jax.lax.broadcasted_iota(jnp.int32, (tb, 1), 0))
            h2t = jnp.where(rows < B, h2t, 0.0)
        s1_ref[...] += jnp.sum(h2t, axis=0, keepdims=True)
        s2_ref[...] += jnp.sum(h2t * h2t, axis=0, keepdims=True)

    h2a, b_s1, b_s2 = pl.pallas_call(
        phase_b,
        grid=(n_tiles,),
        in_specs=[pl.BlockSpec((tb, h1p), lambda i: (i, 0)),
                  pl.BlockSpec((1, h1p), lambda i: (0, 0)),
                  pl.BlockSpec((1, h1p), lambda i: (0, 0)),
                  pl.BlockSpec((h1p, h2), lambda i: (0, 0))],      # weight resident
        out_specs=[pl.BlockSpec((tb, h2), lambda i: (i, 0)),
                   pl.BlockSpec((1, h2), lambda i: (0, 0)),
                   pl.BlockSpec((1, h2), lambda i: (0, 0))],
        out_shape=(jax.ShapeDtypeStruct((b_pad, h2), jnp.float32),
                   jax.ShapeDtypeStruct((1, h2), jnp.float32),
                   jax.ShapeDtypeStruct((1, h2), jnp.float32)),
        compiler_params=pltpu.CompilerParams(
            dimension_semantics=("arbitrary",),
            vmem_limit_bytes=vmem_limit),
    )(h1, sc1, sh1, params["w2h"])

    sc2, sh2 = _fold_bn_scale_shift(b_s1, b_s2, params["g2"], params["be2"],
                                    inv_b, 1.0)

    # ---- phase C: out = relu(BN2(h2)) ----
    def phase_c(h2_ref, sc_ref, sh_ref, o_ref):
        o_ref[...] = jnp.maximum(h2_ref[...] * sc_ref[...] + sh_ref[...],
                                 0.0).astype(o_ref.dtype)

    out = pl.pallas_call(
        phase_c,
        grid=(n_tiles,),
        in_specs=[pl.BlockSpec((tb, h2), lambda i: (i, 0)),
                  pl.BlockSpec((1, h2), lambda i: (0, 0)),
                  pl.BlockSpec((1, h2), lambda i: (0, 0))],
        out_specs=pl.BlockSpec((tb, h2), lambda i: (i, 0)),
        out_shape=jax.ShapeDtypeStruct((b_pad, h2), jnp.float32),
        compiler_params=pltpu.CompilerParams(
            dimension_semantics=("parallel",),    # stateless -> megacore-friendly
            vmem_limit_bytes=vmem_limit),
    )(h2a, sc2, sh2)

    return out[:B] if b_pad != B else out


# ---------------------------------------------------------------------------
# public forward + params
# ---------------------------------------------------------------------------

def projection_forward(x, params, *, tile_b=None):
    """x: (B, nfeat) float32.  tile_b=None -> auto (fused if it fits VMEM,
    otherwise tiled with DEFAULT_TILE_B); pass an int to force batch tiling."""
    B, nfeat = x.shape
    if B < 2:
        # PyTorch BatchNorm1d raises for batch size 1 in training mode.
        raise ValueError("training-mode BatchNorm1d requires batch size > 1")
    h1p = params["w1"].shape[1]
    h2 = params["w2h"].shape[1]
    if tile_b is None:
        fused_fp = _fused_footprint_bytes(B, nfeat, h1p, h2)
        if fused_fp + (4 << 20) <= _vmem_capacity_bytes() // 2:
            return _fused_forward(x, params, _vmem_limit_bytes(fused_fp))
        tile_b = DEFAULT_TILE_B
    tile_b = max(16, (tile_b // 16) * 16)   # bf16 sublane packing / (8,128) rule
    return _tiled_forward(
        x, params, tile_b,
        _vmem_limit_bytes(_tiled_footprint_bytes(tile_b, nfeat, h1p, h2)))


def init_params(key, nfeat, h1=H1, h1_pad=H1_PAD, h2=H2):
    """Deterministic synthetic parameters (shapes follow the PyTorch module).

    Weights pre-transposed to (in, out), hidden dim zero-padded 600 -> 640,
    stored bf16.  Linear biases omitted (exact no-op under training-mode BN).
    w2 is stored pre-scaled by 0.5 ("w2h") to absorb the sigmoid's outer 0.5.
    """
    ks = jax.random.split(key, 6)
    w1 = jax.random.normal(ks[0], (nfeat, h1), jnp.float32) * 0.05
    g1 = 1.0 + 0.01 * jax.random.normal(ks[1], (1, h1), jnp.float32)
    be1 = 0.01 * jax.random.normal(ks[2], (1, h1), jnp.float32)
    w2 = jax.random.normal(ks[3], (h1, h2), jnp.float32) * 0.05
    g2 = 1.0 + 0.01 * jax.random.normal(ks[4], (1, h2), jnp.float32)
    be2 = 0.01 * jax.random.normal(ks[5], (1, h2), jnp.float32)
    pad = h1_pad - h1
    return {
        "w1": jnp.pad(w1, ((0, 0), (0, pad))).astype(jnp.bfloat16),
        "g1": jnp.pad(g1, ((0, 0), (0, pad))),       # pad cols zero -> inert
        "be1": jnp.pad(be1, ((0, 0), (0, pad))),
        "w2h": jnp.pad(0.5 * w2, ((0, pad), (0, 0))).astype(jnp.bfloat16),
        "g2": g2,
        "be2": be2,
    }


def reference_forward(x, params):
    """Faithful (unfolded) mirror of the module: explicit sigmoid, two-pass
    variance, unscaled w2 = 2*w2h.  Same bf16 matmul precision as the kernel."""
    w2 = (params["w2h"].astype(jnp.float32) * 2.0).astype(jnp.bfloat16)

    def bn(h, g, be):
        mu = jnp.mean(h, axis=0, keepdims=True)
        var = jnp.mean(jnp.square(h - mu), axis=0, keepdims=True)
        return (h - mu) * jax.lax.rsqrt(var + BN_EPS) * g + be

    h = jnp.dot(x.astype(jnp.bfloat16), params["w1"],
                preferred_element_type=jnp.float32)
    a = jax.nn.sigmoid(bn(h, params["g1"], params["be1"]))
    h2 = jnp.dot(a.astype(jnp.bfloat16), w2, preferred_element_type=jnp.float32)
    return jnp.maximum(bn(h2, params["g2"], params["be2"]), 0.0)


def _check(out, ref, name):
    assert out.shape == ref.shape, (name, out.shape, ref.shape)
    assert out.dtype == jnp.float32, (name, out.dtype)
    assert bool(jnp.all(out >= 0.0)), name
    err_max = float(jnp.max(jnp.abs(out - ref)))
    err_mean = float(jnp.mean(jnp.abs(out - ref)))
    assert err_max < 5e-2 and err_mean < 5e-3, (name, err_max, err_mean)


if __name__ == "__main__":
    key = jax.random.PRNGKey(0)
    kx, kp, kx2 = jax.random.split(key, 3)

    NFEAT = 32                      # small demo feature dim; hidden 600/1024 fixed
    params = init_params(kp, NFEAT)

    # small batch -> fused single-block kernel
    x_small = jax.random.normal(kx, (8, NFEAT), jnp.float32)
    out_small = jax.block_until_ready(projection_forward(x_small, params))
    _check(out_small, jax.block_until_ready(reference_forward(x_small, params)),
           "fused")

    # larger ragged batch -> 3-phase batch-tiled path (3 tiles, masked last tile)
    x_big = jax.random.normal(kx2, (300, NFEAT), jnp.float32)
    out_big = jax.block_until_ready(projection_forward(x_big, params, tile_b=128))
    _check(out_big, jax.block_until_ready(reference_forward(x_big, params)),
           "tiled")

    print("KERNEL_OK")
</pallas_src>

<mosaic_0001>
module attributes {stable_mosaic.version = 11 : i64} {
  func.func @_fused_kernel(%arg0: memref<8x32xf32, #tpu.memory_space<vmem>>, %arg1: memref<32x640xbf16, #tpu.memory_space<vmem>>, %arg2: memref<1x640xf32, #tpu.memory_space<vmem>>, %arg3: memref<1x640xf32, #tpu.memory_space<vmem>>, %arg4: memref<640x1024xbf16, #tpu.memory_space<vmem>>, %arg5: memref<1x1024xf32, #tpu.memory_space<vmem>>, %arg6: memref<1x1024xf32, #tpu.memory_space<vmem>>, %arg7: memref<8x1024xf32, #tpu.memory_space<vmem>>) attributes {dimension_semantics = [], scalar_prefetch = 0 : i64, scratch_operands = 0 : i64, tpu.core_type = #tpu.core_type<tc>} {
    %c0 = arith.constant 0 : index
    %c0_0 = arith.constant 0 : index
    %0 = vector.load %arg0[%c0, %c0_0] : memref<8x32xf32, #tpu.memory_space<vmem>>, vector<8x32xf32>
    %1 = arith.truncf %0 : vector<8x32xf32> to vector<8x32xbf16>
    %c0_1 = arith.constant 0 : index
    %c0_2 = arith.constant 0 : index
    %2 = vector.load %arg1[%c0_1, %c0_2] : memref<32x640xbf16, #tpu.memory_space<vmem>>, vector<32x640xbf16>
    %cst = arith.constant dense<0.000000e+00> : vector<8x640xf32>
    %3 = tpu.matmul %1, %2, %cst {dimension_numbers = #tpu.dot_dimension_numbers<[1], [0], [0], [1], [0, 0, 1, 1], [], []>} : vector<8x32xbf16>, vector<32x640xbf16>, vector<8x640xf32> -> vector<8x640xf32>
    %cst_3 = arith.constant dense<0.000000e+00> : vector<640xf32>
    %4 = vector.multi_reduction <add>, %3, %cst_3 [0] : vector<8x640xf32> to vector<640xf32>
    %5 = vector.shape_cast %4 : vector<640xf32> to vector<1x640xf32>
    %6 = arith.mulf %3, %3 : vector<8x640xf32>
    %cst_4 = arith.constant dense<0.000000e+00> : vector<640xf32>
    %7 = vector.multi_reduction <add>, %6, %cst_4 [0] : vector<8x640xf32> to vector<640xf32>
    %8 = vector.shape_cast %7 : vector<640xf32> to vector<1x640xf32>
    %c0_5 = arith.constant 0 : index
    %c0_6 = arith.constant 0 : index
    %9 = vector.load %arg2[%c0_5, %c0_6] : memref<1x640xf32, #tpu.memory_space<vmem>>, vector<1x640xf32>
    %c0_7 = arith.constant 0 : index
    %c0_8 = arith.constant 0 : index
    %10 = vector.load %arg3[%c0_7, %c0_8] : memref<1x640xf32, #tpu.memory_space<vmem>>, vector<1x640xf32>
    %cst_9 = arith.constant 1.250000e-01 : f32
    %11 = vector.broadcast %cst_9 : f32 to vector<1x640xf32>
    %12 = arith.mulf %5, %11 : vector<1x640xf32>
    %cst_10 = arith.constant 1.250000e-01 : f32
    %13 = vector.broadcast %cst_10 : f32 to vector<1x640xf32>
    %14 = arith.mulf %8, %13 : vector<1x640xf32>
    %15 = arith.mulf %12, %12 : vector<1x640xf32>
    %16 = arith.subf %14, %15 : vector<1x640xf32>
    %cst_11 = arith.constant 0.000000e+00 : f32
    %17 = vector.broadcast %cst_11 : f32 to vector<1x640xf32>
    %18 = arith.maximumf %16, %17 : vector<1x640xf32>
    %cst_12 = arith.constant 5.000000e-01 : f32
    %19 = vector.broadcast %cst_12 : f32 to vector<1x640xf32>
    %20 = arith.mulf %19, %9 : vector<1x640xf32>
    %cst_13 = arith.constant 9.99999974E-6 : f32
    %21 = vector.broadcast %cst_13 : f32 to vector<1x640xf32>
    %22 = arith.addf %18, %21 : vector<1x640xf32>
    %23 = math.rsqrt %22 : vector<1x640xf32>
    %24 = arith.mulf %20, %23 : vector<1x640xf32>
    %cst_14 = arith.constant 5.000000e-01 : f32
    %25 = vector.broadcast %cst_14 : f32 to vector<1x640xf32>
    %26 = arith.mulf %25, %10 : vector<1x640xf32>
    %27 = arith.mulf %12, %24 : vector<1x640xf32>
    %28 = arith.subf %26, %27 : vector<1x640xf32>
    %29 = vector.broadcast %24 : vector<1x640xf32> to vector<8x640xf32>
    %30 = arith.mulf %3, %29 : vector<8x640xf32>
    %31 = vector.broadcast %28 : vector<1x640xf32> to vector<8x640xf32>
    %32 = arith.addf %30, %31 : vector<8x640xf32>
    %33 = math.tanh %32 : vector<8x640xf32>
    %34 = arith.truncf %33 : vector<8x640xf32> to vector<8x640xbf16>
    %c0_15 = arith.constant 0 : index
    %c0_16 = arith.constant 0 : index
    %35 = vector.load %arg4[%c0_15, %c0_16] : memref<640x1024xbf16, #tpu.memory_space<vmem>>, vector<640x1024xbf16>
    %cst_17 = arith.constant dense<0.000000e+00> : vector<8x1024xf32>
    %36 = tpu.matmul %34, %35, %cst_17 {dimension_numbers = #tpu.dot_dimension_numbers<[1], [0], [0], [1], [0, 0, 1, 1], [], []>} : vector<8x640xbf16>, vector<640x1024xbf16>, vector<8x1024xf32> -> vector<8x1024xf32>
    %cst_18 = arith.constant dense<0.000000e+00> : vector<1024xf32>
    %37 = vector.multi_reduction <add>, %36, %cst_18 [0] : vector<8x1024xf32> to vector<1024xf32>
    %38 = vector.shape_cast %37 : vector<1024xf32> to vector<1x1024xf32>
    %39 = arith.mulf %36, %36 : vector<8x1024xf32>
    %cst_19 = arith.constant dense<0.000000e+00> : vector<1024xf32>
    %40 = vector.multi_reduction <add>, %39, %cst_19 [0] : vector<8x1024xf32> to vector<1024xf32>
    %41 = vector.shape_cast %40 : vector<1024xf32> to vector<1x1024xf32>
    %c0_20 = arith.constant 0 : index
    %c0_21 = arith.constant 0 : index
    %42 = vector.load %arg5[%c0_20, %c0_21] : memref<1x1024xf32, #tpu.memory_space<vmem>>, vector<1x1024xf32>
    %c0_22 = arith.constant 0 : index
    %c0_23 = arith.constant 0 : index
    %43 = vector.load %arg6[%c0_22, %c0_23] : memref<1x1024xf32, #tpu.memory_space<vmem>>, vector<1x1024xf32>
    %cst_24 = arith.constant 1.250000e-01 : f32
    %44 = vector.broadcast %cst_24 : f32 to vector<1x1024xf32>
    %45 = arith.mulf %38, %44 : vector<1x1024xf32>
    %cst_25 = arith.constant 1.250000e-01 : f32
    %46 = vector.broadcast %cst_25 : f32 to vector<1x1024xf32>
    %47 = arith.mulf %41, %46 : vector<1x1024xf32>
    %48 = arith.mulf %45, %45 : vector<1x1024xf32>
    %49 = arith.subf %47, %48 : vector<1x1024xf32>
    %cst_26 = arith.constant 0.000000e+00 : f32
    %50 = vector.broadcast %cst_26 : f32 to vector<1x1024xf32>
    %51 = arith.maximumf %49, %50 : vector<1x1024xf32>
    %cst_27 = arith.constant 1.000000e+00 : f32
    %52 = vector.broadcast %cst_27 : f32 to vector<1x1024xf32>
    %53 = arith.mulf %52, %42 : vector<1x1024xf32>
    %cst_28 = arith.constant 9.99999974E-6 : f32
    %54 = vector.broadcast %cst_28 : f32 to vector<1x1024xf32>
    %55 = arith.addf %51, %54 : vector<1x1024xf32>
    %56 = math.rsqrt %55 : vector<1x1024xf32>
    %57 = arith.mulf %53, %56 : vector<1x1024xf32>
    %cst_29 = arith.constant 1.000000e+00 : f32
    %58 = vector.broadcast %cst_29 : f32 to vector<1x1024xf32>
    %59 = arith.mulf %58, %43 : vector<1x1024xf32>
    %60 = arith.mulf %45, %57 : vector<1x1024xf32>
    %61 = arith.subf %59, %60 : vector<1x1024xf32>
    %62 = vector.broadcast %57 : vector<1x1024xf32> to vector<8x1024xf32>
    %63 = arith.mulf %36, %62 : vector<8x1024xf32>
    %64 = vector.broadcast %61 : vector<1x1024xf32> to vector<8x1024xf32>
    %65 = arith.addf %63, %64 : vector<8x1024xf32>
    %cst_30 = arith.constant 0.000000e+00 : f32
    %66 = vector.broadcast %cst_30 : f32 to vector<8x1024xf32>
    %67 = arith.maximumf %65, %66 : vector<8x1024xf32>
    %c0_31 = arith.constant 0 : index
    %c0_32 = arith.constant 0 : index
    %68 = vector.load %arg7[%c0_31, %c0_32] : memref<8x1024xf32, #tpu.memory_space<vmem>>, vector<8x1024xf32>
    tpu.vector_store %arg7[%c0_31, %c0_32], %67 {strides = array<i32>} : memref<8x1024xf32, #tpu.memory_space<vmem>>, vector<8x1024xf32>,
    return
  }
}

</mosaic_0001>

<bundles_post_ra>
// kernel: tpu_custom_call.1
= control target key start
LH: loop header
LB: loop body
LE: loop exit
PB: predicated region body
PF: predicated region fallthrough
CT: control target
= control target key end

     0   :  { %12 = vsyncpa [#allocation3], 0  ;;  %s4459_s0 = inlined_call_operand.hbm [shape: f32[8,32], index: 0, kind: input, shape index: {}]   ;;  %s4460_s1 = inlined_call_operand.hbm [shape: bf16[32,640], index: 1, kind: input, shape index: {}]   ;;  %s4461_s2 = inlined_call_operand.hbm [shape: f32[1,640], index: 2, kind: input, shape index: {}]   ;;  %s4462_s3 = inlined_call_operand.hbm [shape: f32[1,640], index: 3, kind: input, shape index: {}]   ;;  %s4463_s4 = inlined_call_operand.hbm [shape: bf16[640,1024], index: 4, kind: input, shape index: {}]   ;;  %s4464_s5 = inlined_call_operand.hbm [shape: f32[1,1024], index: 5, kind: input, shape index: {}]   ;;  %s4465_s6 = inlined_call_operand.hbm [shape: f32[1,1024], index: 6, kind: input, shape index: {}]   ;;  %s4466_s7 = inlined_call_operand.hbm [shape: f32[8,1024], index: 7, kind: output, shape index: {}]  }
   0x1   :  { %13 = vsyncpa [#allocation6], 0 }
   0x2   :  { %14 = vsyncpa [#allocation9], 0 }
   0x3   :  { %15 = vsyncpa [#allocation12], 0 }
   0x4   :  { %16 = vsyncpa [#allocation4], 0  ;;  %s4038_s24 = smov [#allocation5]   ;;  %s3852_s28 = scalar_lea.hbm %s4460_s1, 1280 }
   0x5   :  { %s32_s25 = sshll.u32 %s4038_s24, 4  ;;  %p3853_p0 = scmp.ne.s32.totalorder %s4460_s1, %s3852_s28  ;;  %s33_s25 = int_to_ptr.vmem [resolvable:$true] %s32_s25 }
   0x6   :  { %p3856_p1 = scmp.lt.u32.totalorder %s3852_s28, %s4460_s1 }
   0x8   :  { %p3858_p2 = pnand %p3856_p1, %p3853_p0 }
   0xa   :  { %3861 = shalt.err (!%p3858_p2)
}
   0xb   :  { %s3862_s10 = scalar_lea.vmem %s33_s25, 1280  ;;  %p3867_p4 = scmp.lt.s32.totalorder %s33_s25, %s33_s25 }
   0xc   :  { %p3863_p3 = scmp.ne.s32.totalorder %s33_s25, %s3862_s10  ;;  %p3868_p5 = scmp.lt.s32.totalorder %s3862_s10, %s3862_s10 }
   0xe   :  { %p3869_p6 = por %p3868_p5, %p3867_p4 }
  0x10   :  { %p3870_p7 = pnand %p3869_p6, %p3863_p3 }
  0x12   :  { %3873 = shalt.err (!%p3870_p7)
}
  0x13   :  { %s4039_s11 = smov 320   ;;  %s4040_s12 = smov 20  }
  0x14   :  { %38 = dma.hbm_to_vmem [thread:$0]  %s4460_s1, 1280, %s33_s25, [#allocation6], %s4039_s11, %s4039_s11, %s4040_s12  }
  0x15   :  { %s4041_s15 = smov [#allocation8]   ;;  %s4042_s17 = smov [#allocation11]  }
  0x16   :  { %s55_s16 = sshll.u32 %s4041_s15, 4  ;;  %s77_s18 = sshll.u32 %s4042_s17, 4  ;;  %s56_s16 = int_to_ptr.vmem [resolvable:$true] %s55_s16  ;;  %s78_s18 = int_to_ptr.vmem [resolvable:$true] %s77_s18 }
  0x17   :  { %s3874_s21 = scalar_lea.hbm %s4462_s3, 80 }
  0x18   :  { %p3875_p8 = scmp.ne.s32.totalorder %s4462_s3, %s3874_s21  ;;  %p3878_p9 = scmp.lt.u32.totalorder %s3874_s21, %s4462_s3 }
  0x1a   :  { %p3880_p10 = pnand %p3878_p9, %p3875_p8 }
  0x1c   :  { %3883 = shalt.err (!%p3880_p10)
}
  0x1d   :  { %s3884_s1 = scalar_lea.vmem %s56_s16, 80  ;;  %s3888_s25 = scalar_lea.vmem %s56_s16, 96 }
  0x1e   :  { %p3885_p11 = scmp.ne.s32.totalorder %s56_s16, %s3884_s1  ;;  %p3889_p12 = scmp.lt.s32.totalorder %s56_s16, %s56_s16 }
  0x1f   :  { %p3890_p13 = scmp.lt.s32.totalorder %s3888_s25, %s3884_s1 }
  0x21   :  { %p3891_p0 = por %p3890_p13, %p3889_p12 }
  0x23   :  { %p3892_p1 = pnand %p3891_p0, %p3885_p11 }
  0x25   :  { %3895 = shalt.err (!%p3892_p1)
}
  0x26   :  { %58 = dma.hbm_to_vmem [thread:$0]  %s4462_s3, 80, %s56_s16, [#allocation9]  }
  0x27   :  { %s3896_s8 = scalar_lea.hbm %s4464_s5, 128 }
  0x28   :  { %p3897_p2 = scmp.ne.s32.totalorder %s4464_s5, %s3896_s8  ;;  %p3900_p3 = scmp.lt.u32.totalorder %s3896_s8, %s4464_s5 }
  0x2a   :  { %p3902_p4 = pnand %p3900_p3, %p3897_p2 }
  0x2c   :  { %3905 = shalt.err (!%p3902_p4)
}
  0x2d   :  { %s3906_s13 = scalar_lea.vmem %s78_s18, 128  ;;  %p3911_p6 = scmp.lt.s32.totalorder %s78_s18, %s78_s18 }
  0x2e   :  { %p3907_p5 = scmp.ne.s32.totalorder %s78_s18, %s3906_s13  ;;  %p3912_p7 = scmp.lt.s32.totalorder %s3906_s13, %s3906_s13 }
  0x30   :  { %p3913_p8 = por %p3912_p7, %p3911_p6 }
  0x32   :  { %p3914_p9 = pnand %p3913_p8, %p3907_p5 }
  0x34   :  { %3917 = shalt.err (!%p3914_p9)
}
  0x35   :  { %80 = dma.hbm_to_vmem [thread:$0]  %s4464_s5, 128, %s78_s18, [#allocation12]  }
  0x36   :  { %s4043_s15 = smov [#allocation2]   ;;  %s4044_s17 = smov [#allocation7]  }
  0x37   :  { %s23_s16 = sshll.u32 %s4043_s15, 4  ;;  %s45_s19 = sshll.u32 %s4044_s17, 4  ;;  %s24_s16 = int_to_ptr.vmem [resolvable:$true] %s23_s16  ;;  %s46_s19 = int_to_ptr.vmem [resolvable:$true] %s45_s19 }
  0x38   :  { %s3918_s22 = scalar_lea.hbm %s4459_s0, 128 }
  0x39   :  { %p3919_p10 = scmp.ne.s32.totalorder %s4459_s0, %s3918_s22  ;;  %p3922_p11 = scmp.lt.u32.totalorder %s3918_s22, %s4459_s0 }
  0x3b   :  { %p3924_p12 = pnand %p3922_p11, %p3919_p10 }
  0x3d   :  { %3927 = shalt.err (!%p3924_p12)
}
  0x3e   :  { %s3928_s5 = scalar_lea.vmem %s24_s16, 128  ;;  %p3933_p0 = scmp.lt.s32.totalorder %s24_s16, %s24_s16 }
  0x3f   :  { %p3929_p13 = scmp.ne.s32.totalorder %s24_s16, %s3928_s5  ;;  %p3934_p1 = scmp.lt.s32.totalorder %s3928_s5, %s3928_s5 }
  0x41   :  { %p3935_p2 = por %p3934_p1, %p3933_p0 }
  0x43   :  { %p3936_p3 = pnand %p3935_p2, %p3929_p13 }
  0x45   :  { %3939 = shalt.err (!%p3936_p3)
}
  0x46   :  { %26 = dma.hbm_to_vmem [thread:$0]  %s4459_s0, 128, %s24_s16, [#allocation3]  }
  0x47   :  { %s3940_s29 = scalar_lea.hbm %s4461_s2, 80 }
  0x48   :  { %p3941_p4 = scmp.ne.s32.totalorder %s4461_s2, %s3940_s29  ;;  %p3944_p5 = scmp.lt.u32.totalorder %s3940_s29, %s4461_s2 }
  0x4a   :  { %p3946_p6 = pnand %p3944_p5, %p3941_p4 }
  0x4c   :  { %3949 = shalt.err (!%p3946_p6)
}
  0x4d   :  { %s3950_s11 = scalar_lea.vmem %s46_s19, 80  ;;  %s3954_s12 = scalar_lea.vmem %s46_s19, 96 }
  0x4e   :  { %p3951_p7 = scmp.ne.s32.totalorder %s46_s19, %s3950_s11  ;;  %p3955_p8 = scmp.lt.s32.totalorder %s46_s19, %s46_s19 }
  0x4f   :  { %p3956_p9 = scmp.lt.s32.totalorder %s3954_s12, %s3950_s11 }
  0x51   :  { %p3957_p10 = por %p3956_p9, %p3955_p8 }
  0x53   :  { %p3958_p11 = pnand %p3957_p10, %p3951_p7 }
  0x55   :  { %3961 = shalt.err (!%p3958_p11)
}
  0x56   :  { %48 = dma.hbm_to_vmem [thread:$0]  %s4461_s2, 80, %s46_s19, [#allocation6]  }
  0x57   :  { %s4045_s3 = smov [#allocation10]   ;;  %s3962_s17 = scalar_lea.hbm %s4463_s4, 40960 }
  0x58   :  { %s64_s14 = sshll.u32 %s4045_s3, 4  ;;  %p3963_p12 = scmp.ne.s32.totalorder %s4463_s4, %s3962_s17  ;;  %s65_s14 = int_to_ptr.vmem [resolvable:$true] %s64_s14 }
  0x59   :  { %p3966_p13 = scmp.lt.u32.totalorder %s3962_s17, %s4463_s4 }
  0x5b   :  { %p3968_p0 = pnand %p3966_p13, %p3963_p12 }
  0x5d   :  { %3971 = shalt.err (!%p3968_p0)
}
  0x5e   :  { %s3972_s24 = scalar_lea.vmem %s65_s14, 40960  ;;  %p3977_p2 = scmp.lt.s32.totalorder %s65_s14, %s65_s14 }
  0x5f   :  { %p3973_p1 = scmp.ne.s32.totalorder %s65_s14, %s3972_s24  ;;  %p3978_p3 = scmp.lt.s32.totalorder %s3972_s24, %s3972_s24 }
  0x61   :  { %p3979_p4 = por %p3978_p3, %p3977_p2 }
  0x63   :  { %p3980_p5 = pnand %p3979_p4, %p3973_p1 }
  0x65   :  { %3983 = shalt.err (!%p3980_p5)
}
  0x66   :  { %s4046_s2 = smov 512   ;;  %s4047_s19 = smov 32  }
  0x67   :  { %70 = dma.hbm_to_vmem [thread:$0]  %s4463_s4, 40960, %s65_s14, [#allocation9], %s4046_s2, %s4046_s2, %s4047_s19  }
  0x68   :  { %s4048_s5 = smov [#allocation13]   ;;  %s3984_s28 = scalar_lea.hbm %s4465_s6, 128 }
  0x69   :  { %s87_s18 = sshll.u32 %s4048_s5, 4  ;;  %p3985_p6 = scmp.ne.s32.totalorder %s4465_s6, %s3984_s28  ;;  %s88_s18 = int_to_ptr.vmem [resolvable:$true] %s87_s18 }
  0x6a   :  { %p3988_p7 = scmp.lt.u32.totalorder %s3984_s28, %s4465_s6 }
  0x6c   :  { %p3990_p8 = pnand %p3988_p7, %p3985_p6 }
  0x6e   :  { %3993 = shalt.err (!%p3990_p8)
}
  0x6f   :  { %s3994_s10 = scalar_lea.vmem %s88_s18, 128  ;;  %p3999_p10 = scmp.lt.s32.totalorder %s88_s18, %s88_s18 }
  0x70   :  { %p3995_p9 = scmp.ne.s32.totalorder %s88_s18, %s3994_s10  ;;  %p4000_p11 = scmp.lt.s32.totalorder %s3994_s10, %s3994_s10 }
  0x72   :  { %p4001_p12 = por %p4000_p11, %p3999_p10 }
  0x74   :  { %p4002_p13 = pnand %p4001_p12, %p3995_p9 }
  0x76   :  { %4005 = shalt.err (!%p4002_p13)
}
  0x77   :  { %90 = dma.hbm_to_vmem [thread:$0]  %s4465_s6, 128, %s88_s18, [#allocation12]  }
  0x78   :  { %4028 = dma.done.wait [#allocation3], 128  }
  0x79   :  { %4029 = vsyncadd [#allocation3], 4294967168 }
  0x7a   :  { %4030 = dma.done.wait [#allocation6], 1360  }
  0x7b   :  { %4031 = vsyncadd [#allocation6], 4294965936 }
  0x7c   :  { %4032 = dma.done.wait [#allocation9], 41040  }
  0x7d   :  { %4033 = vsyncadd [#allocation9], 4294926256 }
  0x7e   :  { %4034 = dma.done.wait [#allocation12], 256  }
  0x7f   :  { %4035 = vsyncadd [#allocation12], 4294967040  ;;  %v4049_v0 = vmov 0   ;;  %v3802_v1 = vld [vmem:[#allocation5 + $0x4] ss:$20 sps:$4 sm:$0xff]   ;;  %vm179_vm0 = vcmask 261120  }
  0x80   :  { %215 = vmatprep.mubr.bf16.mxu0 %v4049_v0  ;;  %256 = vmatprep.mubr.bf16.mxu1 %v4049_v0  ;;  %v3804_v2 = vld [vmem:[#allocation5 + $0xc] ss:$20 sps:$4 sm:$0xff]   ;;  %v3807_v4 = vld [vmem:[#allocation5 + $0x8] ss:$20 sps:$4 sm:$0xff]   ;;  %v3813_v8 = vld [vmem:[#allocation5 + $0x30] ss:$20 sps:$4 sm:$0xff]  }
  0x81   :  { %183 = vmatprep.subr.bf16.mxu0 %v3802_v1  ;;  %v3806_v3 = vld [vmem:[#allocation5] ss:$20 sps:$4 sm:$0xff]   ;;  %224 = vmatprep.subr.bf16.mxu1 %v3804_v2  ;;  %v3812_v7 = vld [vmem:[#allocation5 + $0x28] ss:$20 sps:$4 sm:$0xff]   ;;  %v3814_v11 = vld [vmem:[#allocation5 + $0x10] ss:$20 sps:$4 sm:$0xff]  }
  0x82   :  { %v3808_v5 = vld [vmem:[#allocation5 + $0x2c] ss:$20 sps:$4 sm:$0xff]   ;;  %184 = vmatpush1.bf16.msra.mxu0 %v3806_v3  ;;  %225 = vmatpush1.bf16.msra.mxu1 %v3807_v4  ;;  %v3810_v6 = vld [vmem:[#allocation5 + $0x34] ss:$20 sps:$4 sm:$0xff]   ;;  %v113_v9 = vld [vmem:[#allocation2] sm:$0xff]  ;;  %v4050_v12 = vmov 0.0  }
  0x83   :  { %185 = vmatprep.subr.bf16.mxu0 %v3808_v5  ;;  %226 = vmatprep.subr.bf16.mxu1 %v3810_v6  ;;  %v114_v10 = vpack.c.bf16 %v113_v9, %v113_v9  ;;  %v3815_v13 = vld [vmem:[#allocation5 + $0x38] ss:$20 sps:$4 sm:$0xff]   ;;  %vm4051_vm1 = vmmov 0   ;;  %v578_v14 = vld [vmem:[#allocation10] sm:$0xff]  ;;  %v579_v16 = vld [vmem:[#allocation10 + $0x8] sm:$0xff]  ;;  %s4053_s6 = smov [#allocation14]  }
  0x84   :  { %v582_v15 = vld [vmem:[#allocation10 + $0x20] sm:$0xff]  ;;  %v583_v18 = vld [vmem:[#allocation10 + $0x28] sm:$0xff]  ;;  %s3398_s12 = sshll.u32 %s4053_s6, 4  ;;  %s3399_s12 = int_to_ptr.vmem [resolvable:$true] %s3398_s12 }
  0x85   :  { %v3424_v17 = vcombine.high %v578_v14, %v582_v15  ;;  %v3423_v19 = vcombine.low %v578_v14, %v582_v15  ;;  %v3425_v20 = vcombine.low %v579_v16, %v583_v18  ;;  %v3426_v21 = vcombine.high %v579_v16, %v583_v18  ;;  %v586_v22 = vld [vmem:[#allocation10 + $0x40] sm:$0xff]  ;;  %v587_v24 = vld [vmem:[#allocation10 + $0x48] sm:$0xff]  ;;  %s4006_s0 = scalar_lea.vmem %s3399_s12, 1024  ;;  %p4011_p1 = scmp.lt.s32.totalorder %s3399_s12, %s3399_s12 }
  0x86   :  { %186 = vmatpush1.bf16.msra.mxu0 %v3812_v7  ;;  %227 = vmatpush1.bf16.msra.mxu1 %v3813_v8  ;;  %v590_v23 = vld [vmem:[#allocation10 + $0x60] sm:$0xff]  ;;  %v591_v26 = vld [vmem:[#allocation10 + $0x68] sm:$0xff]  ;;  %p4007_p0 = scmp.ne.s32.totalorder %s3399_s12, %s4006_s0  ;;  %p4012_p2 = scmp.lt.s32.totalorder %s4006_s0, %s4006_s0 }
  0x87   :  { %3746 = vmatprep.subr.bf16.mxu0 %v4050_v12  ;;  %2498 = vmatprep.subr.bf16.mxu1 %v3424_v17  ;;  %v3432_v25 = vcombine.high %v586_v22, %v590_v23  ;;  %v3431_v27 = vcombine.low %v586_v22, %v590_v23  ;;  %v3433_v28 = vcombine.low %v587_v24, %v591_v26  ;;  %v594_v30 = vld [vmem:[#allocation10 + $0x80] sm:$0xff]  ;;  %v595_v32 = vld [vmem:[#allocation10 + $0x88] sm:$0xff] }
  0x88   :  { %v3434_v29 = vcombine.high %v587_v24, %v591_v26  ;;  %v598_v31 = vld [vmem:[#allocation10 + $0xa0] sm:$0xff]  ;;  %v599_v34 = vld [vmem:[#allocation10 + $0xa8] sm:$0xff]  ;;  %p4013_p3 = por %p4012_p2, %p4011_p1 }
  0x89   :  { %3420 = vmatmul.mubr.msk.bf16.vlgmr.msra.gmra.mrb[0].mxu0 %vm179_vm0, %v114_v10  ;;  %3421 = vmatmul.mubr.msk.bf16.vlgmr.msra.gmra.mrb[0].mxu1 %vm179_vm0, %v114_v10  ;;  %v3440_v33 = vcombine.high %v594_v30, %v598_v31  ;;  %v3439_v35 = vcombine.low %v594_v30, %v598_v31  ;;  %v3441_v36 = vcombine.low %v595_v32, %v599_v34  ;;  %v602_v38 = vld [vmem:[#allocation10 + $0xc0] sm:$0xff]  ;;  %v603_v40 = vld [vmem:[#allocation10 + $0xc8] sm:$0xff] }
  0x8a   :  { %3747 = vmatpush3.bf16.msra.mxu0 %v3814_v11  ;;  %3750 = vmatprep.mubr.msk.bf16.mxu0 %vm4051_vm1, %v4050_v12  ;;  %v3442_v37 = vcombine.high %v595_v32, %v599_v34  ;;  %v606_v39 = vld [vmem:[#allocation10 + $0xe0] sm:$0xff]  ;;  %v607_v41 = vld [vmem:[#allocation10 + $0xe8] sm:$0xff]  ;;  %p4014_p4 = pnand %p4013_p3, %p4007_p0 }
  0x8b   :  { %3748 = vmatprep.subr.bf16.mxu0 %v4050_v12  ;;  %2499 = vmatpush1.bf16.msra.mxu1 %v3423_v19  ;;  %v3447_v42 = vcombine.low %v602_v38, %v606_v39  ;;  %v3448_v43 = vcombine.high %v602_v38, %v606_v39  ;;  %v3449_v44 = vcombine.low %v603_v40, %v607_v41  ;;  %v610_v46 = vld [vmem:[#allocation10 + $0x100] sm:$0xff]  ;;  %v611_v48 = vld [vmem:[#allocation10 + $0x108] sm:$0xff] }
  0x8c   :  { %2500 = vmatprep.subr.bf16.mxu1 %v3432_v25  ;;  %v3450_v45 = vcombine.high %v603_v40, %v607_v41  ;;  %v614_v47 = vld [vmem:[#allocation10 + $0x120] sm:$0xff]  ;;  %v615_v50 = vld [vmem:[#allocation10 + $0x128] sm:$0xff] }
  0x8d   :  { %v3456_v49 = vcombine.high %v610_v46, %v614_v47  ;;  %v3455_v51 = vcombine.low %v610_v46, %v614_v47  ;;  %v3457_v52 = vcombine.low %v611_v48, %v615_v50  ;;  %v3458_v53 = vcombine.high %v611_v48, %v615_v50  ;;  %v618_v54 = vld [vmem:[#allocation10 + $0x140] sm:$0xff]  ;;  %v619_v56 = vld [vmem:[#allocation10 + $0x148] sm:$0xff] }
  0x8e   :  { %3749 = vmatpush3.bf16.msra.mxu0 %v3815_v13  ;;  %v622_v55 = vld [vmem:[#allocation10 + $0x160] sm:$0xff]  ;;  %v623_v58 = vld [vmem:[#allocation10 + $0x168] sm:$0xff] }
  0x8f   :  { %2621 = vmatprep.subr.bf16.mxu0 %v3426_v21  ;;  %2501 = vmatpush1.bf16.msra.mxu1 %v3431_v27  ;;  %v3464_v57 = vcombine.high %v618_v54, %v622_v55  ;;  %v3463_v59 = vcombine.low %v618_v54, %v622_v55  ;;  %v3465_v60 = vcombine.low %v619_v56, %v623_v58  ;;  %v626_v62 = vld [vmem:[#allocation10 + $0x180] sm:$0xff]  ;;  %v627_v1 = vld [vmem:[#allocation10 + $0x188] sm:$0xff] }
  0x90   :  { %2502 = vmatprep.subr.bf16.mxu1 %v3440_v33  ;;  %v3466_v61 = vcombine.high %v619_v56, %v623_v58  ;;  %v630_v63 = vld [vmem:[#allocation10 + $0x1a0] sm:$0xff]  ;;  %v631_v3 = vld [vmem:[#allocation10 + $0x1a8] sm:$0xff] }
  0x91   :  { %3751 = vmatmul.mubr.msk.bf16.vlgmr.msra.gmra.mrb[4].mxu0 %vm179_vm0, %v114_v10  ;;  %v3472_v2 = vcombine.high %v626_v62, %v630_v63  ;;  %v3471_v4 = vcombine.low %v626_v62, %v630_v63  ;;  %v3473_v5 = vcombine.low %v627_v1, %v631_v3  ;;  %v3474_v6 = vcombine.high %v627_v1, %v631_v3  ;;  %v634_v7 = vld [vmem:[#allocation10 + $0x1c0] sm:$0xff]  ;;  %v635_v9 = vld [vmem:[#allocation10 + $0x1c8] sm:$0xff] }
  0x92   :  { %2622 = vmatpush1.bf16.msra.mxu0 %v3425_v20  ;;  %v638_v8 = vld [vmem:[#allocation10 + $0x1e0] sm:$0xff]  ;;  %v639_v11 = vld [vmem:[#allocation10 + $0x1e8] sm:$0xff] }
  0x93   :  { %2623 = vmatprep.subr.bf16.mxu0 %v3434_v29  ;;  %2503 = vmatpush1.bf16.msra.mxu1 %v3439_v35  ;;  %v3480_v10 = vcombine.high %v634_v7, %v638_v8  ;;  %v3479_v12 = vcombine.low %v634_v7, %v638_v8  ;;  %v3481_v13 = vcombine.low %v635_v9, %v639_v11  ;;  %v642_v15 = vld [vmem:[#allocation10 + $0x200] sm:$0xff]  ;;  %v643_v17 = vld [vmem:[#allocation10 + $0x208] sm:$0xff] }
  0x94   :  { %2504 = vmatprep.subr.bf16.mxu1 %v3448_v43  ;;  %v3482_v14 = vcombine.high %v635_v9, %v639_v11  ;;  %v646_v16 = vld [vmem:[#allocation10 + $0x220] sm:$0xff]  ;;  %v647_v19 = vld [vmem:[#allocation10 + $0x228] sm:$0xff] }
  0x95   :  { %v3488_v18 = vcombine.high %v642_v15, %v646_v16  ;;  %v3487_v20 = vcombine.low %v642_v15, %v646_v16  ;;  %v3489_v21 = vcombine.low %v643_v17, %v647_v19  ;;  %v3490_v22 = vcombine.high %v643_v17, %v647_v19  ;;  %v650_v23 = vld [vmem:[#allocation10 + $0x240] sm:$0xff]  ;;  %v651_v25 = vld [vmem:[#allocation10 + $0x248] sm:$0xff] }
  0x96   :  { %2624 = vmatpush1.bf16.msra.mxu0 %v3433_v28  ;;  %v654_v24 = vld [vmem:[#allocation10 + $0x260] sm:$0xff]  ;;  %v655_v27 = vld [vmem:[#allocation10 + $0x268] sm:$0xff] }
  0x97   :  { %2625 = vmatprep.subr.bf16.mxu0 %v3442_v37  ;;  %2505 = vmatpush1.bf16.msra.mxu1 %v3447_v42  ;;  %v3496_v26 = vcombine.high %v650_v23, %v654_v24  ;;  %v3495_v28 = vcombine.low %v650_v23, %v654_v24  ;;  %v3497_v29 = vcombine.low %v651_v25, %v655_v27  ;;  %v658_v31 = vld [vmem:[#allocation10 + $0x280] sm:$0xff]  ;;  %v659_v33 = vld [vmem:[#allocation10 + $0x288] sm:$0xff] }
  0x98   :  { %2506 = vmatprep.subr.bf16.mxu1 %v3456_v49  ;;  %v3498_v30 = vcombine.high %v651_v25, %v655_v27  ;;  %v662_v32 = vld [vmem:[#allocation10 + $0x2a0] sm:$0xff]  ;;  %v663_v35 = vld [vmem:[#allocation10 + $0x2a8] sm:$0xff] }
  0x99   :  { %v3504_v34 = vcombine.high %v658_v31, %v662_v32  ;;  %v3505_v37 = vcombine.low %v659_v33, %v663_v35  ;;  %v3506_v38 = vcombine.high %v659_v33, %v663_v35  ;;  %v666_v39 = vld [vmem:[#allocation10 + $0x2c0] sm:$0xff]  ;;  %v667_v41 = vld [vmem:[#allocation10 + $0x2c8] sm:$0xff] }
  0x9a   :  { %2626 = vmatpush1.bf16.msra.mxu0 %v3441_v36  ;;  %v3503_v36 = vcombine.low %v658_v31, %v662_v32  ;;  %v670_v40 = vld [vmem:[#allocation10 + $0x2e0] sm:$0xff]  ;;  %v671_v43 = vld [vmem:[#allocation10 + $0x2e8] sm:$0xff] }
  0x9b   :  { %2627 = vmatprep.subr.bf16.mxu0 %v3450_v45  ;;  %2507 = vmatpush1.bf16.msra.mxu1 %v3455_v51  ;;  %v3512_v42 = vcombine.high %v666_v39, %v670_v40  ;;  %v3513_v45 = vcombine.low %v667_v41, %v671_v43  ;;  %v3514_v46 = vcombine.high %v667_v41, %v671_v43  ;;  %v674_v47 = vld [vmem:[#allocation10 + $0x300] sm:$0xff]  ;;  %v675_v49 = vld [vmem:[#allocation10 + $0x308] sm:$0xff] }
  0x9c   :  { %2508 = vmatprep.subr.bf16.mxu1 %v3464_v57  ;;  %v678_v48 = vld [vmem:[#allocation10 + $0x320] sm:$0xff]  ;;  %v679_v51 = vld [vmem:[#allocation10 + $0x328] sm:$0xff] }
  0x9d   :  { %v3520_v50 = vcombine.high %v674_v47, %v678_v48  ;;  %v3522_v54 = vcombine.high %v675_v49, %v679_v51  ;;  %v682_v55 = vld [vmem:[#allocation10 + $0x340] sm:$0xff]  ;;  %v683_v57 = vld [vmem:[#allocation10 + $0x348] sm:$0xff] }
  0x9e   :  { %2628 = vmatpush1.bf16.msra.mxu0 %v3449_v44  ;;  %v3511_v44 = vcombine.low %v666_v39, %v670_v40  ;;  %v686_v56 = vld [vmem:[#allocation10 + $0x360] sm:$0xff]  ;;  %v691_v3 = vld [vmem:[#allocation10 + $0x388] sm:$0xff] }
  0x9f   :  { %2629 = vmatprep.subr.bf16.mxu0 %v3458_v53  ;;  %2509 = vmatpush1.bf16.msra.mxu1 %v3463_v59  ;;  %v3521_v53 = vcombine.low %v675_v49, %v679_v51  ;;  %v3527_v58 = vcombine.low %v682_v55, %v686_v56  ;;  %v3528_v59 = vcombine.high %v682_v55, %v686_v56  ;;  %v694_v62 = vld [vmem:[#allocation10 + $0x3a0] sm:$0xff]  ;;  %v699_v8 = vld [vmem:[#allocation10 + $0x3c8] sm:$0xff] }
  0xa0   :  { %2510 = vmatprep.subr.bf16.mxu1 %v3472_v2  ;;  %v702_v7 = vld [vmem:[#allocation10 + $0x3e0] sm:$0xff]  ;;  %v703_v9 = vld [vmem:[#allocation10 + $0x3e8] sm:$0xff] }
  0xa1   :  { %v3545_v15 = vcombine.low %v699_v8, %v703_v9  ;;  %v4180_v16 = vld [vmem:[#allocation10 + $0x400] sm:$0xff] }
  0xa2   :  { %2630 = vmatpush1.bf16.msra.mxu0 %v3457_v52  ;;  %v3519_v52 = vcombine.low %v674_v47, %v678_v48  ;;  %v4182_v17 = vld [vmem:[#allocation10 + $0x420] sm:$0xff] }
  0xa3   :  { %2631 = vmatprep.subr.bf16.mxu0 %v3466_v61  ;;  %2511 = vmatpush1.bf16.msra.mxu1 %v3471_v4  ;;  %v690_v61 = vld [vmem:[#allocation10 + $0x380] sm:$0xff]  ;;  %v695_v4 = vld [vmem:[#allocation10 + $0x3a8] sm:$0xff]  ;;  %v3552_v19 = vcombine.high %v4180_v16, %v4182_v17 }
  0xa4   :  { %2512 = vmatprep.subr.bf16.mxu1 %v3480_v10  ;;  %v3536_v2 = vcombine.high %v690_v61, %v694_v62  ;;  %v3535_v10 = vcombine.low %v690_v61, %v694_v62  ;;  %v3537_v11 = vcombine.low %v691_v3, %v695_v4 }
  0xa6   :  { %2632 = vmatpush1.bf16.msra.mxu0 %v3465_v60  ;;  %v687_v60 = vld [vmem:[#allocation10 + $0x368] sm:$0xff] }
  0xa7   :  { %2633 = vmatprep.subr.bf16.mxu0 %v3474_v6  ;;  %2513 = vmatpush1.bf16.msra.mxu1 %v3479_v12  ;;  %v3529_v63 = vcombine.low %v683_v57, %v687_v60  ;;  %v3530_v1 = vcombine.high %v683_v57, %v687_v60  ;;  %v698_v6 = vld [vmem:[#allocation10 + $0x3c0] sm:$0xff] }
  0xa8   :  { %2514 = vmatprep.subr.bf16.mxu1 %v3488_v18  ;;  %v3544_v12 = vcombine.high %v698_v6, %v702_v7  ;;  %v4184_v18 = vld [vmem:[#allocation10 + $0x408] sm:$0xff] }
  0xaa   :  { %2634 = vmatpush1.bf16.msra.mxu0 %v3473_v5  ;;  %v3538_v5 = vcombine.high %v691_v3, %v695_v4 }
  0xab   :  { %2635 = vmatprep.subr.bf16.mxu0 %v3482_v14  ;;  %2515 = vmatpush1.bf16.msra.mxu1 %v3487_v20  ;;  %v3543_v14 = vcombine.low %v698_v6, %v702_v7  ;;  %v4188_v20 = vld [vmem:[#allocation10 + $0x428] sm:$0xff] }
  0xac   :  { %2516 = vmatprep.subr.bf16.mxu1 %v3496_v26  ;;  %v3554_v23 = vcombine.high %v4184_v18, %v4188_v20 }
  0xae   :  { %2636 = vmatpush1.bf16.msra.mxu0 %v3481_v13  ;;  %v3546_v13 = vcombine.high %v699_v8, %v703_v9 }
  0xaf   :  { %2637 = vmatprep.subr.bf16.mxu0 %v3490_v22  ;;  %2517 = vmatpush1.bf16.msra.mxu1 %v3495_v28  ;;  %v3553_v22 = vcombine.low %v4184_v18, %v4188_v20 }
  0xb0   :  { %2518 = vmatprep.subr.bf16.mxu1 %v3504_v34 }
  0xb2   :  { %2638 = vmatpush1.bf16.msra.mxu0 %v3489_v21  ;;  %v3551_v21 = vcombine.low %v4180_v16, %v4182_v17 }
  0xb3   :  { %2639 = vmatprep.subr.bf16.mxu0 %v3498_v30  ;;  %2519 = vmatpush1.bf16.msra.mxu1 %v3503_v36 }
  0xb4   :  { %2520 = vmatprep.subr.bf16.mxu1 %v3512_v42 }
  0xb6   :  { %2640 = vmatpush1.bf16.msra.mxu0 %v3497_v29 }
  0xb7   :  { %2641 = vmatprep.subr.bf16.mxu0 %v3506_v38  ;;  %2521 = vmatpush1.bf16.msra.mxu1 %v3511_v44 }
  0xb8   :  { %2522 = vmatprep.subr.bf16.mxu1 %v3520_v50 }
  0xba   :  { %2642 = vmatpush1.bf16.msra.mxu0 %v3505_v37 }
  0xbb   :  { %2643 = vmatprep.subr.bf16.mxu0 %v3514_v46  ;;  %2523 = vmatpush1.bf16.msra.mxu1 %v3519_v52 }
  0xbc   :  { %2524 = vmatprep.subr.bf16.mxu1 %v3528_v59 }
  0xbe   :  { %2644 = vmatpush1.bf16.msra.mxu0 %v3513_v45 }
  0xbf   :  { %2645 = vmatprep.subr.bf16.mxu0 %v3522_v54  ;;  %2525 = vmatpush1.bf16.msra.mxu1 %v3527_v58 }
  0xc0   :  { %2526 = vmatprep.subr.bf16.mxu1 %v3536_v2 }
  0xc2   :  { %2646 = vmatpush1.bf16.msra.mxu0 %v3521_v53 }
  0xc3   :  { %2647 = vmatprep.subr.bf16.mxu0 %v3530_v1  ;;  %2527 = vmatpush1.bf16.msra.mxu1 %v3535_v10 }
  0xc4   :  { %2528 = vmatprep.subr.bf16.mxu1 %v3544_v12 }
  0xc6   :  { %2648 = vmatpush1.bf16.msra.mxu0 %v3529_v63 }
  0xc7   :  { %2649 = vmatprep.subr.bf16.mxu0 %v3538_v5  ;;  %2529 = vmatpush1.bf16.msra.mxu1 %v3543_v14 }
  0xc8   :  { %2539 = vmatprep.subr.bf16.mxu1 %v3552_v19 }
  0xca   :  { %2650 = vmatpush1.bf16.msra.mxu0 %v3537_v11 }
  0xcb   :  { %2651 = vmatprep.subr.bf16.mxu0 %v3546_v13 }
  0xce   :  { %2652 = vmatpush1.bf16.msra.mxu0 %v3545_v15 }
  0xcf   :  { %2662 = vmatprep.subr.bf16.mxu0 %v3554_v23 }
 0x15c   :  { %v4196_v24 = vpop.f32.mrb[0].mxu0  ;;  %v4198_v25 = vpop.f32.mrb[0].mxu1 }
 0x15d   :  { %v305_v26 = vrot.slane %v4196_v24, 4  ;;  %v335_v27 = vmul.f32 %v4196_v24, %v4196_v24  ;;  %v317_v28 = vrot.slane %v4198_v25, 4  ;;  %v337_v29 = vmul.f32 %v4198_v25, %v4198_v25  ;;  %v4206_v30 = vpop.f32.mrb[1].mxu0  ;;  %v4208_v31 = vpop.f32.mrb[1].mxu1 }
 0x15e   :  { %v311_v32 = vrot.slane %v4206_v30, 4  ;;  %v336_v33 = vmul.f32 %v4206_v30, %v4206_v30  ;;  %v323_v34 = vrot.slane %v4208_v31, 4  ;;  %v338_v35 = vmul.f32 %v4208_v31, %v4208_v31  ;;  %v221_v36 = vpop.f32.mrb[2].mxu0  ;;  %v262_v37 = vpop.f32.mrb[2].mxu1 }
 0x15f   :  { %v306_v38 = vadd.f32 %v305_v26, %v4196_v24  ;;  %v340_v39 = vrot.slane %v335_v27, 4  ;;  %v318_v40 = vadd.f32 %v317_v28, %v4198_v25  ;;  %v352_v41 = vrot.slane %v337_v29, 4  ;;  %v222_v42 = vpop.f32.mrb[3].mxu0  ;;  %v263_v43 = vpop.f32.mrb[3].mxu1 }
 0x160   :  { %v312_v44 = vadd.f32 %v311_v32, %v4206_v30  ;;  %v346_v45 = vrot.slane %v336_v33, 4  ;;  %v324_v46 = vadd.f32 %v323_v34, %v4208_v31  ;;  %v358_v47 = vrot.slane %v338_v35, 4 }
 0x161   :  { %v307_v48 = vrot.slane %v306_v38, 2  ;;  %v341_v49 = vadd.f32 %v340_v39, %v335_v27  ;;  %v319_v50 = vrot.slane %v318_v40, 2  ;;  %v353_v51 = vadd.f32 %v352_v41, %v337_v29 }
 0x162   :  { %v313_v52 = vrot.slane %v312_v44, 2  ;;  %v347_v53 = vadd.f32 %v346_v45, %v336_v33  ;;  %v325_v54 = vrot.slane %v324_v46, 2  ;;  %v359_v55 = vadd.f32 %v358_v47, %v338_v35 }
 0x163   :  { %v308_v56 = vadd.f32 %v307_v48, %v306_v38  ;;  %v342_v57 = vrot.slane %v341_v49, 2  ;;  %v320_v58 = vadd.f32 %v319_v50, %v318_v40  ;;  %v354_v59 = vrot.slane %v353_v51, 2 }
 0x164   :  { %v314_v60 = vadd.f32 %v313_v52, %v312_v44  ;;  %v348_v61 = vrot.slane %v347_v53, 2  ;;  %v326_v62 = vadd.f32 %v325_v54, %v324_v46  ;;  %v360_v63 = vrot.slane %v359_v55, 2  ;;  %v4220_v1 = vpop.f32.mrb[4].mxu0 }
 0x165   :  { %v309_v2 = vrot.slane %v308_v56, 1  ;;  %v343_v3 = vadd.f32 %v342_v57, %v341_v49  ;;  %v321_v4 = vrot.slane %v320_v58, 1  ;;  %v355_v5 = vadd.f32 %v354_v59, %v353_v51  ;;  %v3752_v6 = vpop.f32.mrb[5].mxu0 }
 0x166   :  { %v315_v7 = vrot.slane %v314_v60, 1  ;;  %v349_v8 = vadd.f32 %v348_v61, %v347_v53  ;;  %v327_v9 = vrot.slane %v326_v62, 1  ;;  %v361_v10 = vadd.f32 %v360_v63, %v359_v55  ;;  %v302_v11 = vpop.f32.mrb[6].mxu0 }
 0x167   :  { %v310_v12 = vadd.f32 %v309_v2, %v308_v56  ;;  %v344_v13 = vrot.slane %v343_v3, 1  ;;  %v322_v14 = vadd.f32 %v321_v4, %v320_v58  ;;  %v356_v15 = vrot.slane %v355_v5, 1  ;;  %v3753_v19 = vpop.f32.mrb[7].mxu0 }
 0x168   :  { %v316_v23 = vadd.f32 %v315_v7, %v314_v60  ;;  %v350_v26 = vrot.slane %v349_v8, 1  ;;  %v328_v27 = vadd.f32 %v327_v9, %v326_v62  ;;  %v362_v28 = vrot.slane %v361_v10, 1 }
 0x169   :  { %v345_v29 = vadd.f32 %v344_v13, %v343_v3  ;;  %v4222_v32 = vmul.f32 0.125, %v310_v12  ;;  %v357_v33 = vadd.f32 %v356_v15, %v355_v5  ;;  %v4224_v34 = vmul.f32 0.125, %v322_v14 }
 0x16a   :  { %v351_v35 = vadd.f32 %v350_v26, %v349_v8  ;;  %v4226_v36 = vmul.f32 0.125, %v316_v23  ;;  %v363_v37 = vadd.f32 %v362_v28, %v361_v10  ;;  %v4228_v38 = vmul.f32 0.125, %v328_v27 }
 0x16b   :  { %v377_v39 = vmul.f32 0.125, %v345_v29  ;;  %v382_v40 = vmul.f32 %v4222_v32, %v4222_v32  ;;  %v379_v41 = vmul.f32 0.125, %v357_v33  ;;  %v384_v42 = vmul.f32 %v4224_v34, %v4224_v34 }
 0x16c   :  { %v378_v43 = vmul.f32 0.125, %v351_v35  ;;  %v383_v44 = vmul.f32 %v4226_v36, %v4226_v36  ;;  %v380_v45 = vmul.f32 0.125, %v363_v37  ;;  %v385_v46 = vmul.f32 %v4228_v38, %v4228_v38 }
 0x16d   :  { %v387_v47 = vsub.f32 %v377_v39, %v382_v40  ;;  %v389_v48 = vsub.f32 %v379_v41, %v384_v42  ;;  %v329_v49 = vrot.slane %v4220_v1, 4  ;;  %v339_v50 = vmul.f32 %v4220_v1, %v4220_v1 }
 0x16e   :  { %v388_v51 = vsub.f32 %v378_v43, %v383_v44  ;;  %v390_v52 = vsub.f32 %v380_v45, %v385_v46  ;;  %v4052_v7 = vmov 1966171168   ;;  %v418_v9 = vlaneseq  ;;  %v370_v46 = vld [vmem:[#allocation7] sm:$0x1f] }
 0x16f   :  { %v392_v53 = vmax.f32 %v387_v47, 0.0  ;;  %v394_v54 = vmax.f32 %v389_v48, 0.0  ;;  %v330_v55 = vadd.f32 %v329_v49, %v4220_v1  ;;  %v364_v56 = vrot.slane %v339_v50, 4 }
 0x170   :  { %v393_v57 = vmax.f32 %v388_v51, 0.0  ;;  %v395_v58 = vmax.f32 %v390_v52, 0.0  ;;  %v416_v8 = vunpack.c.l.s4 %v4052_v7  ;;  %v4242_v15 = vshrl.u32 %v418_v9, 7 }
 0x171   :  { %v398_v59 = vadd.f32 1e-05, %v392_v53  ;;  %v400_v60 = vadd.f32 1e-05, %v394_v54  ;;  %v331_v61 = vrot.slane %v330_v55, 2  ;;  %v365_v62 = vadd.f32 %v364_v56, %v339_v50 }
 0x172   :  { %v399_v63 = vadd.f32 1e-05, %v393_v57  ;;  %v401_v2 = vadd.f32 1e-05, %v395_v58  ;;  %v417_v14 = vunpack.c.0.s8 %v416_v8  ;;  %v397_v48 = vmul.f32 0.5, %v370_v46 }
 0x173   :  { %3816 = vrsqrt.f32 %v398_v59  ;;  %v332_v3 = vadd.f32 %v331_v61, %v330_v55  ;;  %v366_v4 = vrot.slane %v365_v62, 2  ;;  %v4253_v51 = vsub.s32 0, %v4242_v15 }
 0x174   :  { %3818 = vrsqrt.f32 %v400_v60  ;;  %v4245_v29 = vsub.s32 %v417_v14, %v4242_v15  ;;  %v4256_v53 = vsub.s32 1, %v4242_v15  ;;  %v4259_v54 = vsub.s32 2, %v4242_v15 }
 0x175   :  { %3820 = vrsqrt.f32 %v399_v63  ;;  %v333_v5 = vrot.slane %v332_v3, 1  ;;  %v367_v6 = vadd.f32 %v366_v4, %v365_v62  ;;  %v4262_v55 = vsub.s32 3, %v4242_v15 }
 0x176   :  { %3822 = vrsqrt.f32 %v401_v2  ;;  %v4265_v56 = vsub.s32 4, %v4242_v15 }
 0x177   :  { %v334_v10 = vadd.f32 %v333_v5, %v332_v3  ;;  %v368_v11 = vrot.slane %v367_v6, 1 }
 0x179   :  { %v369_v12 = vadd.f32 %v368_v11, %v367_v6  ;;  %v376_v13 = vmul.f32 0.125, %v334_v10 }
 0x17b   :  { %v381_v19 = vmul.f32 0.125, %v369_v12  ;;  %v386_v23 = vmul.f32 %v376_v13, %v376_v13 }
 0x17d   :  { %v3817_v26 = vpop.eup %3816  ;;  %v391_v27 = vsub.f32 %v381_v19, %v386_v23 }
 0x17e   :  { %v3819_v28 = vpop.eup %3818 }
 0x17f   :  { %v3821_v33 = vpop.eup %3820  ;;  %v396_v35 = vmax.f32 %v391_v27, 0.0 }
 0x180   :  { %v3823_v37 = vpop.eup %3822  ;;  %v413_v39 = vcombine.low %v3817_v26, %v3821_v33 }
 0x181   :  { %v414_v40 = vcombine.low %v3819_v28, %v3823_v37  ;;  %v402_v41 = vadd.f32 1e-05, %v396_v35 }
 0x182   :  { %v421_v42 = vrot.slane %v413_v39, %v4245_v29 }
 0x183   :  { %3824 = vrsqrt.f32 %v402_v41  ;;  %v428_v43 = vrot.slane %v414_v40, %v4245_v29  ;;  %v714_v40 = vld [vmem:[#allocation10 + $0x440] sm:$0xff] }
 0x185   :  { %v436_v44 = vcombine.low %v421_v42, %v428_v43  ;;  %v718_v42 = vld [vmem:[#allocation10 + $0x460] sm:$0xff]  ;;  %v715_v43 = vld [vmem:[#allocation10 + $0x448] sm:$0xff] }
 0x187   :  { %v443_v49 = vrot.slane %v436_v44, %v4245_v29  ;;  %v719_v44 = vld [vmem:[#allocation10 + $0x468] sm:$0xff] }
 0x18d   :  { %v3825_v45 = vpop.eup %3824 }
 0x18e   :  { %v435_v47 = vrot.slane %v3825_v45, %v4245_v29 }
 0x190   :  { %v450_v50 = vrot.slane %v435_v47, %v4245_v29 }
 0x192   :  { %v451_v52 = vcombine.low %v443_v49, %v450_v50  ;;  %v722_v49 = vld [vmem:[#allocation10 + $0x480] sm:$0xff]  ;;  %v3560_v50 = vcombine.high %v714_v40, %v718_v42 }
 0x194   :  { %v453_v57 = vmul.f32 %v451_v52, %v397_v48  ;;  %v3562_v52 = vcombine.high %v715_v43, %v719_v44 }
 0x196   :  { %v459_v58 = vrot.slane %v453_v57, %v4253_v51  ;;  %v463_v59 = vrot.slane %v453_v57, %v4256_v53  ;;  %v467_v60 = vrot.slane %v453_v57, %v4259_v54  ;;  %v471_v61 = vrot.slane %v453_v57, %v4262_v55 }
 0x197   :  { %v475_v62 = vrot.slane %v453_v57, %v4265_v56  ;;  %v726_v57 = vld [vmem:[#allocation10 + $0x4a0] sm:$0xff] }
 0x198   :  { %v481_v63 = vmul.f32 %v459_v58, %v4222_v32  ;;  %v482_v2 = vmul.f32 %v463_v59, %v4226_v36  ;;  %v483_v3 = vmul.f32 %v467_v60, %v4224_v34  ;;  %v484_v4 = vmul.f32 %v471_v61, %v4228_v38  ;;  %v371_v38 = vld [vmem:[#allocation8] sm:$0x1f] }
 0x199   :  { %v485_v5 = vmul.f32 %v475_v62, %v376_v13  ;;  %v536_v6 = vmul.f32 %v475_v62, %v4220_v1  ;;  %v533_v7 = vmul.f32 %v463_v59, %v4206_v30  ;;  %v532_v8 = vmul.f32 %v459_v58, %v4196_v24  ;;  %v723_v58 = vld [vmem:[#allocation10 + $0x488] sm:$0xff] }
 0x19a   :  { %v491_v9 = vcombine.low %v481_v63, %v482_v2  ;;  %v492_v10 = vcombine.low %v483_v3, %v484_v4  ;;  %v535_v11 = vmul.f32 %v471_v61, %v4208_v31  ;;  %v534_v12 = vmul.f32 %v467_v60, %v4198_v25  ;;  %v727_v59 = vld [vmem:[#allocation10 + $0x4a8] sm:$0xff]  ;;  %v730_v3 = vld [vmem:[#allocation10 + $0x4c0] sm:$0xff] }
 0x19b   :  { %v513_v34 = vrot.slane %v485_v5, %v4245_v29  ;;  %v454_v14 = vmul.f32 0.5, %v371_v38  ;;  %v3559_v61 = vcombine.low %v714_v40, %v718_v42  ;;  %v3561_v62 = vcombine.low %v715_v43, %v719_v44  ;;  %v734_v4 = vld [vmem:[#allocation10 + $0x4e0] sm:$0xff]  ;;  %v731_v5 = vld [vmem:[#allocation10 + $0x4c8] sm:$0xff] }
 0x19c   :  { %v499_v32 = vrot.slane %v491_v9, %v4245_v29  ;;  %v506_v36 = vrot.slane %v492_v10, %v4245_v29  ;;  %v3568_v63 = vcombine.high %v722_v49, %v726_v57  ;;  %v3570_v2 = vcombine.high %v723_v58, %v727_v59  ;;  %v751_v38 = vld [vmem:[#allocation10 + $0x568] sm:$0xff] }
 0x19d   :  { %v528_v30 = vrot.slane %v513_v34, %v4245_v29  ;;  %v3567_v16 = vcombine.low %v722_v49, %v726_v57  ;;  %v3569_v17 = vcombine.low %v723_v58, %v727_v59  ;;  %v3576_v18 = vcombine.high %v730_v3, %v734_v4  ;;  %v747_v34 = vld [vmem:[#allocation10 + $0x548] sm:$0xff]  ;;  %v774_v49 = vld [vmem:[#allocation10 + $0x620] sm:$0xff] }
 0x19e   :  { %v514_v13 = vcombine.low %v499_v32, %v506_v36  ;;  %v3575_v9 = vcombine.low %v730_v3, %v734_v4  ;;  %v746_v32 = vld [vmem:[#allocation10 + $0x540] sm:$0xff]  ;;  %v763_v40 = vld [vmem:[#allocation10 + $0x5c8] sm:$0xff] }
 0x19f   :  { %v750_v36 = vld [vmem:[#allocation10 + $0x560] sm:$0xff]  ;;  %v783_v3 = vld [vmem:[#allocation10 + $0x668] sm:$0xff] }
 0x1a0   :  { %v521_v1 = vrot.slane %v514_v13, %v4245_v29 }
 0x1a2   :  { %v529_v24 = vcombine.low %v521_v1, %v528_v30  ;;  %v3592_v1 = vcombine.high %v746_v32, %v750_v36  ;;  %v3594_v30 = vcombine.high %v747_v34, %v751_v38 }
 0x1a4   :  { %v531_v19 = vsub.f32 %v454_v14, %v529_v24  ;;  %v754_v24 = vld [vmem:[#allocation10 + $0x580] sm:$0xff] }
 0x1a6   :  { %v557_v23 = vrot.slane %v531_v19, %v4265_v56  ;;  %v545_v31 = vrot.slane %v531_v19, %v4256_v53  ;;  %v541_v25 = vrot.slane %v531_v19, %v4253_v51  ;;  %v553_v26 = vrot.slane %v531_v19, %v4262_v55 }
 0x1a7   :  { %v549_v27 = vrot.slane %v531_v19, %v4259_v54  ;;  %v758_v19 = vld [vmem:[#allocation10 + $0x5a0] sm:$0xff] }
 0x1a8   :  { %v4291_v28 = vadd.f32 %v557_v23, %v536_v6  ;;  %v564_v33 = vadd.f32 %v545_v31, %v533_v7  ;;  %v563_v35 = vadd.f32 %v541_v25, %v532_v8  ;;  %v566_v37 = vadd.f32 %v553_v26, %v535_v11  ;;  %v735_v6 = vld [vmem:[#allocation10 + $0x4e8] sm:$0xff] }
 0x1a9   :  { %v4293_v39 = vadd.f32 %v549_v27, %v534_v12  ;;  %v3578_v20 = vcombine.high %v731_v5, %v735_v6  ;;  %v739_v7 = vld [vmem:[#allocation10 + $0x508] sm:$0xff]  ;;  %v3577_v10 = vcombine.low %v731_v5, %v735_v6  ;;  %v3591_v25 = vcombine.low %v746_v32, %v750_v36 }
 0x1aa   :  { %3826 = vtanh.f32 %v564_v33  ;;  %v743_v8 = vld [vmem:[#allocation10 + $0x528] sm:$0xff]  ;;  %v3593_v26 = vcombine.low %v747_v34, %v751_v38  ;;  %v3600_v27 = vcombine.high %v754_v24, %v758_v19  ;;  %v3599_v42 = vcombine.low %v754_v24, %v758_v19 }
 0x1ab   :  { %3828 = vtanh.f32 %v563_v35  ;;  %v3586_v12 = vcombine.high %v739_v7, %v743_v8  ;;  %v3585_v14 = vcombine.low %v739_v7, %v743_v8  ;;  %v755_v23 = vld [vmem:[#allocation10 + $0x588] sm:$0xff]  ;;  %v762_v35 = vld [vmem:[#allocation10 + $0x5c0] sm:$0xff] }
 0x1ac   :  { %3830 = vtanh.f32 %v566_v37  ;;  %v759_v31 = vld [vmem:[#allocation10 + $0x5a8] sm:$0xff]  ;;  %v766_v37 = vld [vmem:[#allocation10 + $0x5e0] sm:$0xff] }
 0x1ad   :  { %v3602_v33 = vcombine.high %v755_v23, %v759_v31  ;;  %v3601_v43 = vcombine.low %v755_v23, %v759_v31  ;;  %v3608_v44 = vcombine.high %v762_v35, %v766_v37  ;;  %v3607_v57 = vcombine.low %v762_v35, %v766_v37  ;;  %v799_v32 = vld [vmem:[#allocation10 + $0x6e8] sm:$0xff] }
 0x1ae   :  { %v807_v24 = vld [vmem:[#allocation10 + $0x728] sm:$0xff]  ;;  %3832 = vtanh.f32 %v4293_v39 }
 0x1af   :  { %v815_v35 = vld [vmem:[#allocation10 + $0x768] sm:$0xff]  ;;  %3834 = vtanh.f32 %v4291_v28 }
 0x1b0   :  { %v839_v39 = vld [vmem:[#allocation10 + $0x828] sm:$0xff] }
 0x1b4   :  { %v3827_v41 = vpop.eup %3826 }
 0x1b5   :  { %v3829_v45 = vpop.eup %3828  ;;  %v4295_v46 = vpack.c.bf16 %v3827_v41, %v3827_v41  ;;  %v767_v41 = vld [vmem:[#allocation10 + $0x5e8] sm:$0xff] }
 0x1b6   :  { %v3831_v47 = vpop.eup %3830  ;;  %v4297_v48 = vpack.c.bf16 %v3829_v45, %v3829_v45  ;;  %v3610_v45 = vcombine.high %v763_v40, %v767_v41  ;;  %v3609_v58 = vcombine.low %v763_v40, %v767_v41 }
 0x1b7   :  { %2530 = vmatprep.mubr.bf16.mxu1 %v4295_v46  ;;  %2653 = vmatprep.mubr.bf16.mxu0 %v4295_v46  ;;  %v4303_v60 = vpack.c.bf16 %v3831_v47, %v3831_v47  ;;  %v770_v47 = vld [vmem:[#allocation10 + $0x600] sm:$0xff] }
 0x1b8   :  { %2531 = vmatmul.mubr.bf16.vlgmr.msra.gmra.mrb[4].mxu1 %v4297_v48  ;;  %2654 = vmatmul.mubr.bf16.vlgmr.msra.gmra.mrb[8].mxu0 %v4297_v48  ;;  %v3616_v59 = vcombine.high %v770_v47, %v774_v49  ;;  %v3615_v4 = vcombine.low %v770_v47, %v774_v49  ;;  %v823_v47 = vld [vmem:[#allocation10 + $0x7a8] sm:$0xff] }
 0x1b9   :  { %2540 = vmatpush1.bf16.msra.mxu1 %v3551_v21  ;;  %2663 = vmatpush1.bf16.msra.mxu0 %v3553_v22  ;;  %v738_v21 = vld [vmem:[#allocation10 + $0x500] sm:$0xff] }
 0x1ba   :  { %2571 = vmatprep.mubr.bf16.mxu1 %v4303_v60  ;;  %2694 = vmatprep.mubr.bf16.mxu0 %v4303_v60  ;;  %v742_v22 = vld [vmem:[#allocation10 + $0x520] sm:$0xff] }
 0x1bb   :  { %2541 = vmatprep.subr.bf16.mxu1 %v3560_v50  ;;  %2664 = vmatprep.subr.bf16.mxu0 %v3562_v52  ;;  %v3584_v11 = vcombine.high %v738_v21, %v742_v22  ;;  %v3583_v13 = vcombine.low %v738_v21, %v742_v22  ;;  %v771_v50 = vld [vmem:[#allocation10 + $0x608] sm:$0xff] }
 0x1bc   :  { %v775_v52 = vld [vmem:[#allocation10 + $0x628] sm:$0xff] }
 0x1bd   :  { %2542 = vmatpush1.bf16.msra.mxu1 %v3559_v61  ;;  %2665 = vmatpush1.bf16.msra.mxu0 %v3561_v62  ;;  %v3618_v61 = vcombine.high %v771_v50, %v775_v52  ;;  %v778_v62 = vld [vmem:[#allocation10 + $0x640] sm:$0xff]  ;;  %v3617_v5 = vcombine.low %v771_v50, %v775_v52  ;;  %v791_v21 = vld [vmem:[#allocation10 + $0x6a8] sm:$0xff] }
 0x1be   :  { %2543 = vmatprep.subr.bf16.mxu1 %v3568_v63  ;;  %2666 = vmatprep.subr.bf16.mxu0 %v3570_v2  ;;  %v782_v63 = vld [vmem:[#allocation10 + $0x660] sm:$0xff]  ;;  %v779_v2 = vld [vmem:[#allocation10 + $0x648] sm:$0xff] }
 0x1bf   :  { %v3624_v6 = vcombine.high %v778_v62, %v782_v63  ;;  %v3623_v22 = vcombine.low %v778_v62, %v782_v63  ;;  %v3625_v7 = vcombine.low %v779_v2, %v783_v3  ;;  %v831_v62 = vld [vmem:[#allocation10 + $0x7e8] sm:$0xff] }
 0x1c1   :  { %2544 = vmatpush1.bf16.msra.mxu1 %v3567_v16  ;;  %2667 = vmatpush1.bf16.msra.mxu0 %v3569_v17  ;;  %v3626_v16 = vcombine.high %v779_v2, %v783_v3  ;;  %v786_v17 = vld [vmem:[#allocation10 + $0x680] sm:$0xff] }
 0x1c2   :  { %2545 = vmatprep.subr.bf16.mxu1 %v3576_v18  ;;  %2668 = vmatprep.subr.bf16.mxu0 %v3578_v20  ;;  %v790_v18 = vld [vmem:[#allocation10 + $0x6a0] sm:$0xff]  ;;  %v787_v20 = vld [vmem:[#allocation10 + $0x688] sm:$0xff] }
 0x1c3   :  { %v3632_v8 = vcombine.high %v786_v17, %v790_v18  ;;  %v3631_v36 = vcombine.low %v786_v17, %v790_v18  ;;  %v3633_v34 = vcombine.low %v787_v20, %v791_v21 }
 0x1c5   :  { %2546 = vmatpush1.bf16.msra.mxu1 %v3575_v9  ;;  %2669 = vmatpush1.bf16.msra.mxu0 %v3577_v10  ;;  %v3634_v9 = vcombine.high %v787_v20, %v791_v21  ;;  %v794_v10 = vld [vmem:[#allocation10 + $0x6c0] sm:$0xff] }
 0x1c6   :  { %2547 = vmatprep.subr.bf16.mxu1 %v3584_v11  ;;  %2670 = vmatprep.subr.bf16.mxu0 %v3586_v12  ;;  %v798_v11 = vld [vmem:[#allocation10 + $0x6e0] sm:$0xff]  ;;  %v795_v12 = vld [vmem:[#allocation10 + $0x6c8] sm:$0xff] }
 0x1c7   :  { %v3640_v38 = vcombine.high %v794_v10, %v798_v11  ;;  %v3639_v19 = vcombine.low %v794_v10, %v798_v11  ;;  %v3641_v23 = vcombine.low %v795_v12, %v799_v32  ;;  %v847_v10 = vld [vmem:[#allocation10 + $0x868] sm:$0xff] }
 0x1c9   :  { %2548 = vmatpush1.bf16.msra.mxu1 %v3583_v13  ;;  %2671 = vmatpush1.bf16.msra.mxu0 %v3585_v14  ;;  %v3642_v13 = vcombine.high %v795_v12, %v799_v32  ;;  %v802_v14 = vld [vmem:[#allocation10 + $0x700] sm:$0xff] }
 0x1ca   :  { %2549 = vmatprep.subr.bf16.mxu1 %v3592_v1  ;;  %2672 = vmatprep.subr.bf16.mxu0 %v3594_v30  ;;  %v806_v1 = vld [vmem:[#allocation10 + $0x720] sm:$0xff]  ;;  %v803_v30 = vld [vmem:[#allocation10 + $0x708] sm:$0xff] }
 0x1cb   :  { %v3648_v31 = vcombine.high %v802_v14, %v806_v1  ;;  %v3647_v37 = vcombine.low %v802_v14, %v806_v1  ;;  %v3649_v40 = vcombine.low %v803_v30, %v807_v24  ;;  %v851_v14 = vld [vmem:[#allocation10 + $0x888] sm:$0xff] }
 0x1cc   :  { %v855_v1 = vld [vmem:[#allocation10 + $0x8a8] sm:$0xff] }
 0x1cd   :  { %2550 = vmatpush1.bf16.msra.mxu1 %v3591_v25  ;;  %2673 = vmatpush1.bf16.msra.mxu0 %v3593_v26  ;;  %v3650_v25 = vcombine.high %v803_v30, %v807_v24  ;;  %v810_v26 = vld [vmem:[#allocation10 + $0x740] sm:$0xff] }
 0x1ce   :  { %2551 = vmatprep.subr.bf16.mxu1 %v3600_v27  ;;  %2674 = vmatprep.subr.bf16.mxu0 %v3602_v33  ;;  %v814_v27 = vld [vmem:[#allocation10 + $0x760] sm:$0xff]  ;;  %v811_v33 = vld [vmem:[#allocation10 + $0x748] sm:$0xff] }
 0x1cf   :  { %v3656_v41 = vcombine.high %v810_v26, %v814_v27  ;;  %v3655_v49 = vcombine.low %v810_v26, %v814_v27  ;;  %v3657_v50 = vcombine.low %v811_v33, %v815_v35  ;;  %v859_v26 = vld [vmem:[#allocation10 + $0x8c8] sm:$0xff] }
 0x1d0   :  { %v863_v27 = vld [vmem:[#allocation10 + $0x8e8] sm:$0xff] }
 0x1d1   :  { %2552 = vmatpush1.bf16.msra.mxu1 %v3599_v42  ;;  %2675 = vmatpush1.bf16.msra.mxu0 %v3601_v43  ;;  %v3658_v42 = vcombine.high %v811_v33, %v815_v35  ;;  %v818_v43 = vld [vmem:[#allocation10 + $0x780] sm:$0xff]  ;;  %v3697_v35 = vcombine.low %v851_v14, %v855_v1 }
 0x1d2   :  { %2553 = vmatprep.subr.bf16.mxu1 %v3608_v44  ;;  %2676 = vmatprep.subr.bf16.mxu0 %v3610_v45  ;;  %v822_v44 = vld [vmem:[#allocation10 + $0x7a0] sm:$0xff]  ;;  %v819_v45 = vld [vmem:[#allocation10 + $0x788] sm:$0xff] }
 0x1d3   :  { %v3664_v52 = vcombine.high %v818_v43, %v822_v44  ;;  %v3663_v63 = vcombine.low %v818_v43, %v822_v44  ;;  %v3665_v2 = vcombine.low %v819_v45, %v823_v47  ;;  %v867_v43 = vld [vmem:[#allocation10 + $0x908] sm:$0xff] }
 0x1d4   :  { %v871_v44 = vld [vmem:[#allocation10 + $0x928] sm:$0xff] }
 0x1d5   :  { %2554 = vmatpush1.bf16.msra.mxu1 %v3607_v57  ;;  %2677 = vmatpush1.bf16.msra.mxu0 %v3609_v58  ;;  %v3666_v57 = vcombine.high %v819_v45, %v823_v47  ;;  %v826_v58 = vld [vmem:[#allocation10 + $0x7c0] sm:$0xff]  ;;  %v3705_v47 = vcombine.low %v859_v26, %v863_v27 }
 0x1d6   :  { %2555 = vmatprep.subr.bf16.mxu1 %v3616_v59  ;;  %2678 = vmatprep.subr.bf16.mxu0 %v3618_v61  ;;  %v830_v59 = vld [vmem:[#allocation10 + $0x7e0] sm:$0xff]  ;;  %v827_v61 = vld [vmem:[#allocation10 + $0x7c8] sm:$0xff] }
 0x1d7   :  { %v3672_v3 = vcombine.high %v826_v58, %v830_v59  ;;  %v3671_v17 = vcombine.low %v826_v58, %v830_v59  ;;  %v3673_v18 = vcombine.low %v827_v61, %v831_v62  ;;  %v875_v58 = vld [vmem:[#allocation10 + $0x948] sm:$0xff] }
 0x1d8   :  { %v879_v59 = vld [vmem:[#allocation10 + $0x968] sm:$0xff] }
 0x1d9   :  { %2556 = vmatpush1.bf16.msra.mxu1 %v3615_v4  ;;  %2679 = vmatpush1.bf16.msra.mxu0 %v3617_v5  ;;  %v3674_v4 = vcombine.high %v827_v61, %v831_v62  ;;  %v834_v5 = vld [vmem:[#allocation10 + $0x800] sm:$0xff]  ;;  %v3713_v62 = vcombine.low %v867_v43, %v871_v44 }
 0x1da   :  { %2557 = vmatprep.subr.bf16.mxu1 %v3624_v6  ;;  %2680 = vmatprep.subr.bf16.mxu0 %v3626_v16  ;;  %v838_v6 = vld [vmem:[#allocation10 + $0x820] sm:$0xff]  ;;  %v835_v16 = vld [vmem:[#allocation10 + $0x808] sm:$0xff] }
 0x1db   :  { %v3680_v20 = vcombine.high %v834_v5, %v838_v6  ;;  %v3682_v21 = vcombine.high %v835_v16, %v839_v39  ;;  %v3679_v11 = vcombine.low %v834_v5, %v838_v6  ;;  %v3681_v12 = vcombine.low %v835_v16, %v839_v39  ;;  %v883_v5 = vld [vmem:[#allocation10 + $0x988] sm:$0xff] }
 0x1dc   :  { %v887_v6 = vld [vmem:[#allocation10 + $0x9a8] sm:$0xff]  ;;  %v3721_v39 = vcombine.low %v875_v58, %v879_v59 }
 0x1dd   :  { %2558 = vmatpush1.bf16.msra.mxu1 %v3623_v22  ;;  %2681 = vmatpush1.bf16.msra.mxu0 %v3625_v7  ;;  %v842_v22 = vld [vmem:[#allocation10 + $0x840] sm:$0xff]  ;;  %v3833_v7 = vpop.eup %3832 }
 0x1de   :  { %2559 = vmatprep.subr.bf16.mxu1 %v3632_v8  ;;  %2682 = vmatprep.subr.bf16.mxu0 %v3634_v9  ;;  %v846_v8 = vld [vmem:[#allocation10 + $0x860] sm:$0xff]  ;;  %v843_v9 = vld [vmem:[#allocation10 + $0x848] sm:$0xff]  ;;  %v4314_v32 = vpack.c.bf16 %v3833_v7, %v3833_v7 }
 0x1df   :  { %v3687_v30 = vcombine.low %v842_v22, %v846_v8  ;;  %v3689_v24 = vcombine.low %v843_v9, %v847_v10  ;;  %v895_v7 = vld [vmem:[#allocation10 + $0x9e8] sm:$0xff] }
 0x1e1   :  { %2560 = vmatpush1.bf16.msra.mxu1 %v3631_v36  ;;  %2683 = vmatpush1.bf16.msra.mxu0 %v3633_v34  ;;  %v3688_v36 = vcombine.high %v842_v22, %v846_v8  ;;  %v3690_v34 = vcombine.high %v843_v9, %v847_v10  ;;  %v891_v22 = vld [vmem:[#allocation10 + $0x9c8] sm:$0xff]  ;;  %v3729_v9 = vcombine.low %v883_v5, %v887_v6 }
 0x1e2   :  { %2561 = vmatprep.subr.bf16.mxu1 %v3640_v38  ;;  %2684 = vmatprep.subr.bf16.mxu0 %v3642_v13  ;;  %v850_v38 = vld [vmem:[#allocation10 + $0x880] sm:$0xff]  ;;  %v3738_v28 = vcombine.high %v891_v22, %v895_v7 }
 0x1e3   :  { %v854_v13 = vld [vmem:[#allocation10 + $0x8a0] sm:$0xff] }
 0x1e4   :  { %v3695_v33 = vcombine.low %v850_v38, %v854_v13 }
 0x1e5   :  { %2562 = vmatpush1.bf16.msra.mxu1 %v3639_v19  ;;  %2685 = vmatpush1.bf16.msra.mxu0 %v3641_v23  ;;  %v3696_v19 = vcombine.high %v850_v38, %v854_v13  ;;  %v3698_v23 = vcombine.high %v851_v14, %v855_v1  ;;  %v3737_v13 = vcombine.low %v891_v22, %v895_v7 }
 0x1e6   :  { %2563 = vmatprep.subr.bf16.mxu1 %v3648_v31  ;;  %2686 = vmatprep.subr.bf16.mxu0 %v3650_v25  ;;  %v858_v31 = vld [vmem:[#allocation10 + $0x8c0] sm:$0xff] }
 0x1e7   :  { %v862_v25 = vld [vmem:[#allocation10 + $0x8e0] sm:$0xff] }
 0x1e8   :  { %v3703_v45 = vcombine.low %v858_v31, %v862_v25 }
 0x1e9   :  { %2564 = vmatpush1.bf16.msra.mxu1 %v3647_v37  ;;  %2687 = vmatpush1.bf16.msra.mxu0 %v3649_v40  ;;  %v3704_v37 = vcombine.high %v858_v31, %v862_v25  ;;  %v3706_v40 = vcombine.high %v859_v26, %v863_v27  ;;  %v593_v31 = vld [vmem:[#allocation10 + $0x78] sm:$0xff] }
 0x1ea   :  { %2565 = vmatprep.subr.bf16.mxu1 %v3656_v41  ;;  %2688 = vmatprep.subr.bf16.mxu0 %v3658_v42  ;;  %v866_v41 = vld [vmem:[#allocation10 + $0x900] sm:$0xff] }
 0x1eb   :  { %v870_v42 = vld [vmem:[#allocation10 + $0x920] sm:$0xff] }
 0x1ec   :  { %v3711_v61 = vcombine.low %v866_v41, %v870_v42 }
 0x1ed   :  { %2566 = vmatpush1.bf16.msra.mxu1 %v3655_v49  ;;  %2689 = vmatpush1.bf16.msra.mxu0 %v3657_v50  ;;  %v3712_v49 = vcombine.high %v866_v41, %v870_v42  ;;  %v3714_v50 = vcombine.high %v867_v43, %v871_v44  ;;  %v597_v41 = vld [vmem:[#allocation10 + $0x98] sm:$0xff] }
 0x1ee   :  { %2567 = vmatprep.subr.bf16.mxu1 %v3664_v52  ;;  %2690 = vmatprep.subr.bf16.mxu0 %v3666_v57  ;;  %v874_v52 = vld [vmem:[#allocation10 + $0x940] sm:$0xff]  ;;  %v601_v42 = vld [vmem:[#allocation10 + $0xb8] sm:$0xff] }
 0x1ef   :  { %v878_v57 = vld [vmem:[#allocation10 + $0x960] sm:$0xff] }
 0x1f0   :  { %v3719_v16 = vcombine.low %v874_v52, %v878_v57 }
 0x1f1   :  { %2568 = vmatpush1.bf16.msra.mxu1 %v3663_v63  ;;  %2691 = vmatpush1.bf16.msra.mxu0 %v3665_v2  ;;  %v3720_v63 = vcombine.high %v874_v52, %v878_v57  ;;  %v3722_v2 = vcombine.high %v875_v58, %v879_v59  ;;  %v605_v52 = vld [vmem:[#allocation10 + $0xd8] sm:$0xff]  ;;  %v3445_v59 = vcombine.low %v597_v41, %v601_v42 }
 0x1f2   :  { %2569 = vmatprep.subr.bf16.mxu1 %v3672_v3  ;;  %2692 = vmatprep.subr.bf16.mxu0 %v3674_v4  ;;  %v882_v3 = vld [vmem:[#allocation10 + $0x980] sm:$0xff]  ;;  %v609_v57 = vld [vmem:[#allocation10 + $0xf8] sm:$0xff] }
 0x1f3   :  { %v886_v4 = vld [vmem:[#allocation10 + $0x9a0] sm:$0xff] }
 0x1f4   :  { %v3727_v8 = vcombine.low %v882_v3, %v886_v4 }
 0x1f5   :  { %2570 = vmatpush1.bf16.msra.mxu1 %v3671_v17  ;;  %2693 = vmatpush1.bf16.msra.mxu0 %v3673_v18  ;;  %v3728_v17 = vcombine.high %v882_v3, %v886_v4  ;;  %v3730_v18 = vcombine.high %v883_v5, %v887_v6  ;;  %v617_v3 = vld [vmem:[#allocation10 + $0x138] sm:$0xff]  ;;  %v3453_v5 = vcombine.low %v605_v52, %v609_v57 }
 0x1f6   :  { %2580 = vmatprep.subr.bf16.mxu1 %v3680_v20  ;;  %2703 = vmatprep.subr.bf16.mxu0 %v3682_v21  ;;  %v890_v20 = vld [vmem:[#allocation10 + $0x9c0] sm:$0xff] }
 0x1f7   :  { %v894_v21 = vld [vmem:[#allocation10 + $0x9e0] sm:$0xff] }
 0x1f8   :  { %2572 = vmatmul.mubr.bf16.vlgmr.msra.gmra.mrb[4].mxu1 %v4314_v32  ;;  %2695 = vmatmul.mubr.bf16.vlgmr.msra.gmra.mrb[8].mxu0 %v4314_v32  ;;  %v3736_v10 = vcombine.high %v890_v20, %v894_v21  ;;  %v3735_v38 = vcombine.low %v890_v20, %v894_v21  ;;  %v625_v20 = vld [vmem:[#allocation10 + $0x178] sm:$0xff] }
 0x1f9   :  { %2581 = vmatpush1.bf16.msra.mxu1 %v3679_v11  ;;  %2704 = vmatpush1.bf16.msra.mxu0 %v3681_v12  ;;  %v580_v11 = vld [vmem:[#allocation10 + $0x10] sm:$0xff] }
 0x1fa   :  { %2582 = vmatprep.subr.bf16.mxu1 %v3688_v36  ;;  %2705 = vmatprep.subr.bf16.mxu0 %v3690_v34  ;;  %v584_v12 = vld [vmem:[#allocation10 + $0x30] sm:$0xff]  ;;  %v581_v36 = vld [vmem:[#allocation10 + $0x18] sm:$0xff] }
 0x1fb   :  { %2612 = vmatprep.mubr.bf16.mxu1 %v4049_v0  ;;  %2735 = vmatprep.mubr.bf16.mxu0 %v4049_v0  ;;  %v585_v34 = vld [vmem:[#allocation10 + $0x38] sm:$0xff]  ;;  %v3428_v14 = vcombine.high %v580_v11, %v584_v12  ;;  %v3427_v25 = vcombine.low %v580_v11, %v584_v12 }
 0x1fc   :  { %v3430_v1 = vcombine.high %v581_v36, %v585_v34  ;;  %v3429_v27 = vcombine.low %v581_v36, %v585_v34  ;;  %v633_v11 = vld [vmem:[#allocation10 + $0x1b8] sm:$0xff] }
 0x1fd   :  { %2583 = vmatpush1.bf16.msra.mxu1 %v3687_v30  ;;  %2706 = vmatpush1.bf16.msra.mxu0 %v3689_v24  ;;  %v3835_v30 = vpop.eup %3834  ;;  %v588_v24 = vld [vmem:[#allocation10 + $0x50] sm:$0xff] }
 0x1fe   :  { %2584 = vmatprep.subr.bf16.mxu1 %v3696_v19  ;;  %2707 = vmatprep.subr.bf16.mxu0 %v3698_v23  ;;  %v592_v19 = vld [vmem:[#allocation10 + $0x70] sm:$0xff]  ;;  %v589_v23 = vld [vmem:[#allocation10 + $0x58] sm:$0xff]  ;;  %v4321_v26 = vpack.c.bf16 %v3835_v30, %v3835_v30 }
 0x1ff   :  { %v3435_v43 = vcombine.low %v588_v24, %v592_v19  ;;  %v3437_v44 = vcombine.low %v589_v23, %v593_v31  ;;  %v641_v30 = vld [vmem:[#allocation10 + $0x1f8] sm:$0xff] }
 0x201   :  { %2585 = vmatpush1.bf16.msra.mxu1 %v3695_v33  ;;  %2708 = vmatpush1.bf16.msra.mxu0 %v3697_v35  ;;  %v3436_v33 = vcombine.high %v588_v24, %v592_v19  ;;  %v3438_v35 = vcombine.high %v589_v23, %v593_v31 }
 0x202   :  { %2586 = vmatprep.subr.bf16.mxu1 %v3704_v37  ;;  %2709 = vmatprep.subr.bf16.mxu0 %v3706_v40  ;;  %v596_v37 = vld [vmem:[#allocation10 + $0x90] sm:$0xff] }
 0x203   :  { %v600_v40 = vld [vmem:[#allocation10 + $0xb0] sm:$0xff] }
 0x204   :  { %v3443_v58 = vcombine.low %v596_v37, %v600_v40 }
 0x205   :  { %2587 = vmatpush1.bf16.msra.mxu1 %v3703_v45  ;;  %2710 = vmatpush1.bf16.msra.mxu0 %v3705_v47  ;;  %v3444_v45 = vcombine.high %v596_v37, %v600_v40  ;;  %v3446_v47 = vcombine.high %v597_v41, %v601_v42 }
 0x206   :  { %2588 = vmatprep.subr.bf16.mxu1 %v3712_v49  ;;  %2711 = vmatprep.subr.bf16.mxu0 %v3714_v50  ;;  %v604_v49 = vld [vmem:[#allocation10 + $0xd0] sm:$0xff] }
 0x207   :  { %v608_v50 = vld [vmem:[#allocation10 + $0xf0] sm:$0xff] }
 0x208   :  { %v3451_v4 = vcombine.low %v604_v49, %v608_v50 }
 0x209   :  { %2589 = vmatpush1.bf16.msra.mxu1 %v3711_v61  ;;  %2712 = vmatpush1.bf16.msra.mxu0 %v3713_v62  ;;  %v3452_v61 = vcombine.high %v604_v49, %v608_v50  ;;  %v3454_v62 = vcombine.high %v605_v52, %v609_v57 }
 0x20a   :  { %2590 = vmatprep.subr.bf16.mxu1 %v3720_v63  ;;  %2713 = vmatprep.subr.bf16.mxu0 %v3722_v2  ;;  %v612_v63 = vld [vmem:[#allocation10 + $0x110] sm:$0xff] }
 0x20b   :  { %v616_v2 = vld [vmem:[#allocation10 + $0x130] sm:$0xff] }
 0x20c   :  { %v3460_v6 = vcombine.high %v612_v63, %v616_v2  ;;  %v3459_v21 = vcombine.low %v612_v63, %v616_v2 }
 0x20d   :  { %2591 = vmatpush1.bf16.msra.mxu1 %v3719_v16  ;;  %2714 = vmatpush1.bf16.msra.mxu0 %v3721_v39  ;;  %v620_v39 = vld [vmem:[#allocation10 + $0x150] sm:$0xff] }
 0x20e   :  { %2592 = vmatprep.subr.bf16.mxu1 %v3728_v17  ;;  %2715 = vmatprep.subr.bf16.mxu0 %v3730_v18  ;;  %v624_v17 = vld [vmem:[#allocation10 + $0x170] sm:$0xff]  ;;  %v621_v18 = vld [vmem:[#allocation10 + $0x158] sm:$0xff] }
 0x20f   :  { %v3468_v7 = vcombine.high %v620_v39, %v624_v17  ;;  %v3467_v12 = vcombine.low %v620_v39, %v624_v17  ;;  %v3469_v36 = vcombine.low %v621_v18, %v625_v20 }
 0x211   :  { %2593 = vmatpush1.bf16.msra.mxu1 %v3727_v8  ;;  %2716 = vmatpush1.bf16.msra.mxu0 %v3729_v9  ;;  %v3470_v8 = vcombine.high %v621_v18, %v625_v20  ;;  %v628_v9 = vld [vmem:[#allocation10 + $0x190] sm:$0xff] }
 0x212   :  { %2594 = vmatprep.subr.bf16.mxu1 %v3736_v10  ;;  %2717 = vmatprep.subr.bf16.mxu0 %v3738_v28  ;;  %v632_v10 = vld [vmem:[#allocation10 + $0x1b0] sm:$0xff]  ;;  %v629_v28 = vld [vmem:[#allocation10 + $0x198] sm:$0xff] }
 0x213   :  { %v3476_v34 = vcombine.high %v628_v9, %v632_v10  ;;  %v3475_v24 = vcombine.low %v628_v9, %v632_v10  ;;  %v3477_v19 = vcombine.low %v629_v28, %v633_v11 }
 0x215   :  { %2595 = vmatpush1.bf16.msra.mxu1 %v3735_v38  ;;  %2718 = vmatpush1.bf16.msra.mxu0 %v3737_v13  ;;  %v3478_v38 = vcombine.high %v629_v28, %v633_v11  ;;  %v636_v13 = vld [vmem:[#allocation10 + $0x1d0] sm:$0xff] }
 0x216   :  { %2744 = vmatprep.subr.bf16.mxu1 %v3428_v14  ;;  %2867 = vmatprep.subr.bf16.mxu0 %v3430_v1  ;;  %v640_v14 = vld [vmem:[#allocation10 + $0x1f0] sm:$0xff]  ;;  %v637_v1 = vld [vmem:[#allocation10 + $0x1d8] sm:$0xff] }
 0x217   :  { %v3484_v23 = vcombine.high %v636_v13, %v640_v14  ;;  %v3486_v31 = vcombine.high %v637_v1, %v641_v30  ;;  %v3483_v37 = vcombine.low %v636_v13, %v640_v14  ;;  %v3485_v40 = vcombine.low %v637_v1, %v641_v30 }
 0x218   :  { %2613 = vmatmul.mubr.bf16.vlgmr.msra.gmra.mrb[4].mxu1 %v4321_v26  ;;  %2736 = vmatmul.mubr.bf16.vlgmr.msra.gmra.mrb[8].mxu0 %v4321_v26 }
 0x219   :  { %2745 = vmatpush1.bf16.msra.mxu1 %v3427_v25  ;;  %2776 = vmatprep.mubr.bf16.mxu1 %v4295_v46  ;;  %v644_v25 = vld [vmem:[#allocation10 + $0x210] sm:$0xff] }
 0x21a   :  { %2868 = vmatpush1.bf16.msra.mxu0 %v3429_v27  ;;  %2899 = vmatprep.mubr.bf16.mxu0 %v4295_v46  ;;  %v613_v46 = vld [vmem:[#allocation10 + $0x118] sm:$0xff]  ;;  %v648_v27 = vld [vmem:[#allocation10 + $0x230] sm:$0xff] }
 0x21b   :  { %2746 = vmatprep.subr.bf16.mxu1 %v3436_v33  ;;  %2869 = vmatprep.subr.bf16.mxu0 %v3438_v35  ;;  %v3462_v16 = vcombine.high %v613_v46, %v617_v3  ;;  %v3461_v22 = vcombine.low %v613_v46, %v617_v3  ;;  %v645_v33 = vld [vmem:[#allocation10 + $0x218] sm:$0xff]  ;;  %v3492_v41 = vcombine.high %v644_v25, %v648_v27 }
 0x21c   :  { %v649_v35 = vld [vmem:[#allocation10 + $0x238] sm:$0xff]  ;;  %v3491_v49 = vcombine.low %v644_v25, %v648_v27 }
 0x21d   :  { %2747 = vmatpush1.bf16.msra.mxu1 %v3435_v43  ;;  %v3494_v42 = vcombine.high %v645_v33, %v649_v35  ;;  %v652_v43 = vld [vmem:[#allocation10 + $0x250] sm:$0xff]  ;;  %v3493_v50 = vcombine.low %v645_v33, %v649_v35 }
 0x21e   :  { %2870 = vmatpush1.bf16.msra.mxu0 %v3437_v44  ;;  %2748 = vmatprep.subr.bf16.mxu1 %v3444_v45  ;;  %v656_v44 = vld [vmem:[#allocation10 + $0x270] sm:$0xff]  ;;  %v653_v45 = vld [vmem:[#allocation10 + $0x258] sm:$0xff] }
 0x21f   :  { %2871 = vmatprep.subr.bf16.mxu0 %v3446_v47  ;;  %v657_v47 = vld [vmem:[#allocation10 + $0x278] sm:$0xff]  ;;  %v3500_v52 = vcombine.high %v652_v43, %v656_v44  ;;  %v3499_v63 = vcombine.low %v652_v43, %v656_v44 }
 0x220   :  { %v3502_v57 = vcombine.high %v653_v45, %v657_v47  ;;  %v3501_v2 = vcombine.low %v653_v45, %v657_v47 }
 0x221   :  { %2749 = vmatpush1.bf16.msra.mxu1 %v3443_v58  ;;  %v660_v58 = vld [vmem:[#allocation10 + $0x290] sm:$0xff] }
 0x222   :  { %2872 = vmatpush1.bf16.msra.mxu0 %v3445_v59  ;;  %2750 = vmatprep.subr.bf16.mxu1 %v3452_v61  ;;  %v664_v59 = vld [vmem:[#allocation10 + $0x2b0] sm:$0xff]  ;;  %v661_v61 = vld [vmem:[#allocation10 + $0x298] sm:$0xff] }
 0x223   :  { %2873 = vmatprep.subr.bf16.mxu0 %v3454_v62  ;;  %v665_v62 = vld [vmem:[#allocation10 + $0x2b8] sm:$0xff]  ;;  %v3508_v46 = vcombine.high %v660_v58, %v664_v59  ;;  %v3507_v39 = vcombine.low %v660_v58, %v664_v59 }
 0x224   :  { %v3510_v3 = vcombine.high %v661_v61, %v665_v62  ;;  %v3509_v17 = vcombine.low %v661_v61, %v665_v62 }
 0x225   :  { %2751 = vmatpush1.bf16.msra.mxu1 %v3451_v4  ;;  %v668_v4 = vld [vmem:[#allocation10 + $0x2d0] sm:$0xff] }
 0x226   :  { %2874 = vmatpush1.bf16.msra.mxu0 %v3453_v5  ;;  %2752 = vmatprep.subr.bf16.mxu1 %v3460_v6  ;;  %v672_v5 = vld [vmem:[#allocation10 + $0x2f0] sm:$0xff]  ;;  %v669_v6 = vld [vmem:[#allocation10 + $0x2d8] sm:$0xff] }
 0x227   :  { %2875 = vmatprep.subr.bf16.mxu0 %v3462_v16  ;;  %v673_v16 = vld [vmem:[#allocation10 + $0x2f8] sm:$0xff]  ;;  %v3516_v18 = vcombine.high %v668_v4, %v672_v5  ;;  %v3515_v9 = vcombine.low %v668_v4, %v672_v5 }
 0x228   :  { %v3518_v20 = vcombine.high %v669_v6, %v673_v16  ;;  %v3517_v10 = vcombine.low %v669_v6, %v673_v16  ;;  %v721_v4 = vld [vmem:[#allocation10 + $0x478] sm:$0xff]  ;;  %v724_v16 = vld [vmem:[#allocation10 + $0x490] sm:$0xff] }
 0x229   :  { %2753 = vmatpush1.bf16.msra.mxu1 %v3459_v21  ;;  %v676_v21 = vld [vmem:[#allocation10 + $0x310] sm:$0xff] }
 0x22a   :  { %2876 = vmatpush1.bf16.msra.mxu0 %v3461_v22  ;;  %2754 = vmatprep.subr.bf16.mxu1 %v3468_v7  ;;  %v680_v22 = vld [vmem:[#allocation10 + $0x330] sm:$0xff]  ;;  %v677_v7 = vld [vmem:[#allocation10 + $0x318] sm:$0xff] }
 0x22b   :  { %2877 = vmatprep.subr.bf16.mxu0 %v3470_v8  ;;  %v681_v8 = vld [vmem:[#allocation10 + $0x338] sm:$0xff]  ;;  %v3524_v28 = vcombine.high %v676_v21, %v680_v22  ;;  %v3523_v13 = vcombine.low %v676_v21, %v680_v22 }
 0x22c   :  { %v3526_v11 = vcombine.high %v677_v7, %v681_v8  ;;  %v3525_v14 = vcombine.low %v677_v7, %v681_v8 }
 0x22d   :  { %2755 = vmatpush1.bf16.msra.mxu1 %v3467_v12  ;;  %v684_v12 = vld [vmem:[#allocation10 + $0x350] sm:$0xff] }
 0x22e   :  { %2878 = vmatpush1.bf16.msra.mxu0 %v3469_v36  ;;  %2756 = vmatprep.subr.bf16.mxu1 %v3476_v34  ;;  %v688_v36 = vld [vmem:[#allocation10 + $0x370] sm:$0xff]  ;;  %v685_v34 = vld [vmem:[#allocation10 + $0x358] sm:$0xff] }
 0x22f   :  { %2879 = vmatprep.subr.bf16.mxu0 %v3478_v38  ;;  %v689_v38 = vld [vmem:[#allocation10 + $0x378] sm:$0xff]  ;;  %v3532_v1 = vcombine.high %v684_v12, %v688_v36  ;;  %v3531_v25 = vcombine.low %v684_v12, %v688_v36 }
 0x230   :  { %v3534_v30 = vcombine.high %v685_v34, %v689_v38  ;;  %v3533_v27 = vcombine.low %v685_v34, %v689_v38  ;;  %v740_v38 = vld [vmem:[#allocation10 + $0x510] sm:$0xff] }
 0x231   :  { %2757 = vmatpush1.bf16.msra.mxu1 %v3475_v24  ;;  %v692_v24 = vld [vmem:[#allocation10 + $0x390] sm:$0xff] }
 0x232   :  { %2880 = vmatpush1.bf16.msra.mxu0 %v3477_v19  ;;  %2758 = vmatprep.subr.bf16.mxu1 %v3484_v23  ;;  %v696_v19 = vld [vmem:[#allocation10 + $0x3b0] sm:$0xff]  ;;  %v693_v23 = vld [vmem:[#allocation10 + $0x398] sm:$0xff] }
 0x233   :  { %2881 = vmatprep.subr.bf16.mxu0 %v3486_v31  ;;  %v697_v31 = vld [vmem:[#allocation10 + $0x3b8] sm:$0xff]  ;;  %v3540_v33 = vcombine.high %v692_v24, %v696_v19  ;;  %v3539_v43 = vcombine.low %v692_v24, %v696_v19 }
 0x234   :  { %v3542_v35 = vcombine.high %v693_v23, %v697_v31  ;;  %v3541_v44 = vcombine.low %v693_v23, %v697_v31  ;;  %v748_v23 = vld [vmem:[#allocation10 + $0x550] sm:$0xff] }
 0x235   :  { %2759 = vmatpush1.bf16.msra.mxu1 %v3483_v37  ;;  %v700_v37 = vld [vmem:[#allocation10 + $0x3d0] sm:$0xff] }
 0x236   :  { %2882 = vmatpush1.bf16.msra.mxu0 %v3485_v40  ;;  %2760 = vmatprep.subr.bf16.mxu1 %v3492_v41  ;;  %v704_v40 = vld [vmem:[#allocation10 + $0x3f0] sm:$0xff]  ;;  %v701_v41 = vld [vmem:[#allocation10 + $0x3d8] sm:$0xff] }
 0x237   :  { %2883 = vmatprep.subr.bf16.mxu0 %v3494_v42  ;;  %v705_v42 = vld [vmem:[#allocation10 + $0x3f8] sm:$0xff]  ;;  %v3548_v45 = vcombine.high %v700_v37, %v704_v40  ;;  %v3547_v58 = vcombine.low %v700_v37, %v704_v40  ;;  %v752_v31 = vld [vmem:[#allocation10 + $0x570] sm:$0xff] }
 0x238   :  { %v3550_v47 = vcombine.high %v701_v41, %v705_v42  ;;  %v3549_v59 = vcombine.low %v701_v41, %v705_v42  ;;  %v3596_v37 = vcombine.high %v748_v23, %v752_v31  ;;  %v756_v41 = vld [vmem:[#allocation10 + $0x590] sm:$0xff] }
 0x239   :  { %2761 = vmatpush1.bf16.msra.mxu1 %v3491_v49  ;;  %v708_v49 = vld [vmem:[#allocation10 + $0x410] sm:$0xff] }
 0x23a   :  { %2884 = vmatpush1.bf16.msra.mxu0 %v3493_v50  ;;  %2762 = vmatprep.subr.bf16.mxu1 %v3500_v52  ;;  %v712_v50 = vld [vmem:[#allocation10 + $0x430] sm:$0xff]  ;;  %v709_v52 = vld [vmem:[#allocation10 + $0x418] sm:$0xff] }
 0x23b   :  { %2885 = vmatprep.subr.bf16.mxu0 %v3502_v57  ;;  %v713_v57 = vld [vmem:[#allocation10 + $0x438] sm:$0xff]  ;;  %v3556_v61 = vcombine.high %v708_v49, %v712_v50  ;;  %v760_v42 = vld [vmem:[#allocation10 + $0x5b0] sm:$0xff] }
 0x23c   :  { %v3558_v62 = vcombine.high %v709_v52, %v713_v57  ;;  %v3557_v5 = vcombine.low %v709_v52, %v713_v57  ;;  %v764_v52 = vld [vmem:[#allocation10 + $0x5d0] sm:$0xff] }
 0x23d   :  { %2763 = vmatpush1.bf16.msra.mxu1 %v3499_v63  ;;  %v716_v63 = vld [vmem:[#allocation10 + $0x450] sm:$0xff] }
 0x23e   :  { %2886 = vmatpush1.bf16.msra.mxu0 %v3501_v2  ;;  %2764 = vmatprep.subr.bf16.mxu1 %v3508_v46  ;;  %v720_v2 = vld [vmem:[#allocation10 + $0x470] sm:$0xff]  ;;  %v3555_v46 = vcombine.low %v708_v49, %v712_v50  ;;  %v3604_v49 = vcombine.high %v756_v41, %v760_v42 }
 0x23f   :  { %2887 = vmatprep.subr.bf16.mxu0 %v3510_v3  ;;  %v717_v3 = vld [vmem:[#allocation10 + $0x458] sm:$0xff]  ;;  %v3564_v6 = vcombine.high %v716_v63, %v720_v2  ;;  %v3563_v21 = vcombine.low %v716_v63, %v720_v2  ;;  %v768_v57 = vld [vmem:[#allocation10 + $0x5f0] sm:$0xff] }
 0x240   :  { %v3565_v22 = vcombine.low %v717_v3, %v721_v4  ;;  %v3612_v63 = vcombine.high %v764_v52, %v768_v57 }
 0x241   :  { %2765 = vmatpush1.bf16.msra.mxu1 %v3507_v39  ;;  %v728_v39 = vld [vmem:[#allocation10 + $0x4b0] sm:$0xff] }
 0x242   :  { %2888 = vmatpush1.bf16.msra.mxu0 %v3509_v17  ;;  %2766 = vmatprep.subr.bf16.mxu1 %v3516_v18  ;;  %v3566_v17 = vcombine.high %v717_v3, %v721_v4  ;;  %v725_v18 = vld [vmem:[#allocation10 + $0x498] sm:$0xff]  ;;  %v3572_v7 = vcombine.high %v724_v16, %v728_v39  ;;  %v3571_v12 = vcombine.low %v724_v16, %v728_v39  ;;  %v776_v3 = vld [vmem:[#allocation10 + $0x630] sm:$0xff] }
 0x243   :  { %2889 = vmatprep.subr.bf16.mxu0 %v3518_v20  ;;  %v729_v20 = vld [vmem:[#allocation10 + $0x4b8] sm:$0xff] }
 0x244   :  { %v3574_v8 = vcombine.high %v725_v18, %v729_v20  ;;  %v773_v4 = vld [vmem:[#allocation10 + $0x618] sm:$0xff] }
 0x245   :  { %2767 = vmatpush1.bf16.msra.mxu1 %v3515_v9  ;;  %v732_v9 = vld [vmem:[#allocation10 + $0x4d0] sm:$0xff] }
 0x246   :  { %2890 = vmatpush1.bf16.msra.mxu0 %v3517_v10  ;;  %2768 = vmatprep.subr.bf16.mxu1 %v3524_v28  ;;  %v736_v10 = vld [vmem:[#allocation10 + $0x4f0] sm:$0xff]  ;;  %v733_v28 = vld [vmem:[#allocation10 + $0x4d8] sm:$0xff] }
 0x247   :  { %2891 = vmatprep.subr.bf16.mxu0 %v3526_v11  ;;  %v737_v11 = vld [vmem:[#allocation10 + $0x4f8] sm:$0xff]  ;;  %v3580_v36 = vcombine.high %v732_v9, %v736_v10 }
 0x248   :  { %v3582_v34 = vcombine.high %v733_v28, %v737_v11 }
 0x249   :  { %2769 = vmatpush1.bf16.msra.mxu1 %v3523_v13  ;;  %v744_v13 = vld [vmem:[#allocation10 + $0x530] sm:$0xff] }
 0x24a   :  { %2892 = vmatpush1.bf16.msra.mxu0 %v3525_v14  ;;  %2770 = vmatprep.subr.bf16.mxu1 %v3532_v1  ;;  %v741_v14 = vld [vmem:[#allocation10 + $0x518] sm:$0xff]  ;;  %v3588_v24 = vcombine.high %v740_v38, %v744_v13 }
 0x24b   :  { %2893 = vmatprep.subr.bf16.mxu0 %v3534_v30  ;;  %v745_v1 = vld [vmem:[#allocation10 + $0x538] sm:$0xff]  ;;  %v3581_v30 = vcombine.low %v733_v28, %v737_v11  ;;  %v788_v28 = vld [vmem:[#allocation10 + $0x690] sm:$0xff] }
 0x24c   :  { %v3590_v19 = vcombine.high %v741_v14, %v745_v1  ;;  %v792_v11 = vld [vmem:[#allocation10 + $0x6b0] sm:$0xff] }
 0x24d   :  { %2771 = vmatpush1.bf16.msra.mxu1 %v3531_v25  ;;  %v749_v25 = vld [vmem:[#allocation10 + $0x558] sm:$0xff] }
 0x24e   :  { %2894 = vmatpush1.bf16.msra.mxu0 %v3533_v27  ;;  %2772 = vmatprep.subr.bf16.mxu1 %v3540_v33  ;;  %v753_v27 = vld [vmem:[#allocation10 + $0x578] sm:$0xff]  ;;  %v3587_v33 = vcombine.low %v740_v38, %v744_v13  ;;  %v3636_v38 = vcombine.high %v788_v28, %v792_v11 }
 0x24f   :  { %2895 = vmatprep.subr.bf16.mxu0 %v3542_v35  ;;  %v3589_v35 = vcombine.low %v741_v14, %v745_v1  ;;  %v3598_v40 = vcombine.high %v749_v25, %v753_v27  ;;  %v796_v14 = vld [vmem:[#allocation10 + $0x6d0] sm:$0xff] }
 0x250   :  { %v800_v1 = vld [vmem:[#allocation10 + $0x6f0] sm:$0xff] }
 0x251   :  { %2773 = vmatpush1.bf16.msra.mxu1 %v3539_v43  ;;  %v757_v43 = vld [vmem:[#allocation10 + $0x598] sm:$0xff] }
 0x252   :  { %2896 = vmatpush1.bf16.msra.mxu0 %v3541_v44  ;;  %2774 = vmatprep.subr.bf16.mxu1 %v3548_v45  ;;  %v761_v44 = vld [vmem:[#allocation10 + $0x5b8] sm:$0xff]  ;;  %v3595_v45 = vcombine.low %v748_v23, %v752_v31  ;;  %v3644_v23 = vcombine.high %v796_v14, %v800_v1 }
 0x253   :  { %2897 = vmatprep.subr.bf16.mxu0 %v3550_v47  ;;  %v3597_v47 = vcombine.low %v749_v25, %v753_v27  ;;  %v3606_v50 = vcombine.high %v757_v43, %v761_v44  ;;  %v804_v25 = vld [vmem:[#allocation10 + $0x710] sm:$0xff] }
 0x254   :  { %v808_v27 = vld [vmem:[#allocation10 + $0x730] sm:$0xff] }
 0x255   :  { %2775 = vmatpush1.bf16.msra.mxu1 %v3547_v58  ;;  %v765_v58 = vld [vmem:[#allocation10 + $0x5d8] sm:$0xff] }
 0x256   :  { %2898 = vmatpush1.bf16.msra.mxu0 %v3549_v59  ;;  %2785 = vmatprep.subr.bf16.mxu1 %v3556_v61  ;;  %v769_v59 = vld [vmem:[#allocation10 + $0x5f8] sm:$0xff]  ;;  %v3603_v61 = vcombine.low %v756_v41, %v760_v42  ;;  %v3652_v41 = vcombine.high %v804_v25, %v808_v27 }
 0x257   :  { %2908 = vmatprep.subr.bf16.mxu0 %v3558_v62  ;;  %v3605_v62 = vcombine.low %v757_v43, %v761_v44  ;;  %v3614_v2 = vcombine.high %v765_v58, %v769_v59  ;;  %v3613_v16 = vcombine.low %v765_v58, %v769_v59  ;;  %v812_v43 = vld [vmem:[#allocation10 + $0x750] sm:$0xff] }
 0x258   :  { %2777 = vmatmul.mubr.bf16.vlgmr.msra.gmra.mrb[8].mxu1 %v4297_v48  ;;  %v816_v44 = vld [vmem:[#allocation10 + $0x770] sm:$0xff] }
 0x259   :  { %2900 = vmatmul.mubr.bf16.vlgmr.msra.gmra.mrb[12].mxu0 %v4297_v48  ;;  %2786 = vmatpush1.bf16.msra.mxu1 %v3555_v46  ;;  %v3573_v48 = vcombine.low %v725_v18, %v729_v20  ;;  %v772_v46 = vld [vmem:[#allocation10 + $0x610] sm:$0xff] }
 0x25a   :  { %2817 = vmatprep.mubr.bf16.mxu1 %v4303_v60  ;;  %2909 = vmatpush1.bf16.msra.mxu0 %v3557_v5  ;;  %v777_v5 = vld [vmem:[#allocation10 + $0x638] sm:$0xff]  ;;  %v3620_v39 = vcombine.high %v772_v46, %v776_v3  ;;  %v780_v18 = vld [vmem:[#allocation10 + $0x650] sm:$0xff] }
 0x25b   :  { %2940 = vmatprep.mubr.bf16.mxu0 %v4303_v60  ;;  %2787 = vmatprep.subr.bf16.mxu1 %v3564_v6  ;;  %v3579_v60 = vcombine.low %v732_v9, %v736_v10  ;;  %v3611_v6 = vcombine.low %v764_v52, %v768_v57  ;;  %v784_v20 = vld [vmem:[#allocation10 + $0x670] sm:$0xff]  ;;  %v3660_v52 = vcombine.high %v812_v43, %v816_v44 }
 0x25c   :  { %2910 = vmatprep.subr.bf16.mxu0 %v3566_v17  ;;  %v3622_v17 = vcombine.high %v773_v4, %v777_v5  ;;  %v3628_v9 = vcombine.high %v780_v18, %v784_v20  ;;  %v820_v58 = vld [vmem:[#allocation10 + $0x790] sm:$0xff] }
 0x25d   :  { %2788 = vmatpush1.bf16.msra.mxu1 %v3563_v21  ;;  %v781_v21 = vld [vmem:[#allocation10 + $0x658] sm:$0xff]  ;;  %v824_v59 = vld [vmem:[#allocation10 + $0x7b0] sm:$0xff] }
 0x25e   :  { %2911 = vmatpush1.bf16.msra.mxu0 %v3565_v22  ;;  %2789 = vmatprep.subr.bf16.mxu1 %v3572_v7  ;;  %v785_v22 = vld [vmem:[#allocation10 + $0x678] sm:$0xff]  ;;  %v3619_v7 = vcombine.low %v772_v46, %v776_v3  ;;  %v3668_v46 = vcombine.high %v820_v58, %v824_v59 }
 0x25f   :  { %2912 = vmatprep.subr.bf16.mxu0 %v3574_v8  ;;  %v3621_v8 = vcombine.low %v773_v4, %v777_v5  ;;  %v3630_v10 = vcombine.high %v781_v21, %v785_v22  ;;  %v828_v4 = vld [vmem:[#allocation10 + $0x7d0] sm:$0xff] }
 0x260   :  { %v832_v5 = vld [vmem:[#allocation10 + $0x7f0] sm:$0xff] }
 0x261   :  { %2790 = vmatpush1.bf16.msra.mxu1 %v3571_v12  ;;  %v789_v12 = vld [vmem:[#allocation10 + $0x698] sm:$0xff] }
 0x262   :  { %2913 = vmatpush1.bf16.msra.mxu0 %v3573_v48  ;;  %2791 = vmatprep.subr.bf16.mxu1 %v3580_v36  ;;  %v793_v48 = vld [vmem:[#allocation10 + $0x6b8] sm:$0xff]  ;;  %v3627_v36 = vcombine.low %v780_v18, %v784_v20  ;;  %v3676_v18 = vcombine.high %v828_v4, %v832_v5 }
 0x263   :  { %2914 = vmatprep.subr.bf16.mxu0 %v3582_v34  ;;  %v3629_v34 = vcombine.low %v781_v21, %v785_v22  ;;  %v3638_v13 = vcombine.high %v789_v12, %v793_v48  ;;  %v836_v21 = vld [vmem:[#allocation10 + $0x810] sm:$0xff] }
 0x264   :  { %v840_v22 = vld [vmem:[#allocation10 + $0x830] sm:$0xff] }
 0x265   :  { %2792 = vmatpush1.bf16.msra.mxu1 %v3579_v60  ;;  %v797_v60 = vld [vmem:[#allocation10 + $0x6d8] sm:$0xff] }
 0x266   :  { %2915 = vmatpush1.bf16.msra.mxu0 %v3581_v30  ;;  %2793 = vmatprep.subr.bf16.mxu1 %v3588_v24  ;;  %v801_v30 = vld [vmem:[#allocation10 + $0x6f8] sm:$0xff]  ;;  %v3635_v24 = vcombine.low %v788_v28, %v792_v11  ;;  %v3684_v28 = vcombine.high %v836_v21, %v840_v22 }
 0x267   :  { %2916 = vmatprep.subr.bf16.mxu0 %v3590_v19  ;;  %v3637_v19 = vcombine.low %v789_v12, %v793_v48  ;;  %v3646_v31 = vcombine.high %v797_v60, %v801_v30  ;;  %v844_v12 = vld [vmem:[#allocation10 + $0x850] sm:$0xff] }
 0x268   :  { %v848_v48 = vld [vmem:[#allocation10 + $0x870] sm:$0xff] }
 0x269   :  { %2794 = vmatpush1.bf16.msra.mxu1 %v3587_v33  ;;  %v805_v33 = vld [vmem:[#allocation10 + $0x718] sm:$0xff] }
 0x26a   :  { %2917 = vmatpush1.bf16.msra.mxu0 %v3589_v35  ;;  %2795 = vmatprep.subr.bf16.mxu1 %v3596_v37  ;;  %v809_v35 = vld [vmem:[#allocation10 + $0x738] sm:$0xff]  ;;  %v3643_v37 = vcombine.low %v796_v14, %v800_v1  ;;  %v3692_v14 = vcombine.high %v844_v12, %v848_v48 }
 0x26b   :  { %2918 = vmatprep.subr.bf16.mxu0 %v3598_v40  ;;  %v3645_v40 = vcombine.low %v797_v60, %v801_v30  ;;  %v3654_v42 = vcombine.high %v805_v33, %v809_v35  ;;  %v852_v60 = vld [vmem:[#allocation10 + $0x890] sm:$0xff] }
 0x26c   :  { %v856_v30 = vld [vmem:[#allocation10 + $0x8b0] sm:$0xff] }
 0x26d   :  { %2796 = vmatpush1.bf16.msra.mxu1 %v3595_v45  ;;  %v813_v45 = vld [vmem:[#allocation10 + $0x758] sm:$0xff] }
 0x26e   :  { %2919 = vmatpush1.bf16.msra.mxu0 %v3597_v47  ;;  %2797 = vmatprep.subr.bf16.mxu1 %v3604_v49  ;;  %v817_v47 = vld [vmem:[#allocation10 + $0x778] sm:$0xff]  ;;  %v3651_v49 = vcombine.low %v804_v25, %v808_v27  ;;  %v3700_v25 = vcombine.high %v852_v60, %v856_v30 }
 0x26f   :  { %2920 = vmatprep.subr.bf16.mxu0 %v3606_v50  ;;  %v3653_v50 = vcombine.low %v805_v33, %v809_v35  ;;  %v3662_v57 = vcombine.high %v813_v45, %v817_v47  ;;  %v860_v33 = vld [vmem:[#allocation10 + $0x8d0] sm:$0xff] }
 0x270   :  { %v864_v35 = vld [vmem:[#allocation10 + $0x8f0] sm:$0xff] }
 0x271   :  { %2798 = vmatpush1.bf16.msra.mxu1 %v3603_v61  ;;  %v821_v61 = vld [vmem:[#allocation10 + $0x798] sm:$0xff] }
 0x272   :  { %2921 = vmatpush1.bf16.msra.mxu0 %v3605_v62  ;;  %2799 = vmatprep.subr.bf16.mxu1 %v3612_v63  ;;  %v825_v62 = vld [vmem:[#allocation10 + $0x7b8] sm:$0xff]  ;;  %v3659_v63 = vcombine.low %v812_v43, %v816_v44  ;;  %v868_v44 = vld [vmem:[#allocation10 + $0x910] sm:$0xff] }
 0x273   :  { %2922 = vmatprep.subr.bf16.mxu0 %v3614_v2  ;;  %v3661_v2 = vcombine.low %v813_v45, %v817_v47  ;;  %v3670_v3 = vcombine.high %v821_v61, %v825_v62  ;;  %v872_v45 = vld [vmem:[#allocation10 + $0x930] sm:$0xff]  ;;  %v869_v47 = vld [vmem:[#allocation10 + $0x918] sm:$0xff] }
 0x275   :  { %2800 = vmatpush1.bf16.msra.mxu1 %v3611_v6  ;;  %v829_v6 = vld [vmem:[#allocation10 + $0x7d8] sm:$0xff] }
 0x276   :  { %2923 = vmatpush1.bf16.msra.mxu0 %v3613_v16  ;;  %2801 = vmatprep.subr.bf16.mxu1 %v3620_v39  ;;  %v833_v16 = vld [vmem:[#allocation10 + $0x7f8] sm:$0xff]  ;;  %v3667_v39 = vcombine.low %v820_v58, %v824_v59  ;;  %v876_v58 = vld [vmem:[#allocation10 + $0x950] sm:$0xff] }
 0x277   :  { %2924 = vmatprep.subr.bf16.mxu0 %v3622_v17  ;;  %v3669_v17 = vcombine.low %v821_v61, %v825_v62  ;;  %v3678_v20 = vcombine.high %v829_v6, %v833_v16  ;;  %v880_v59 = vld [vmem:[#allocation10 + $0x970] sm:$0xff]  ;;  %v877_v61 = vld [vmem:[#allocation10 + $0x958] sm:$0xff] }
 0x278   :  { %v881_v62 = vld [vmem:[#allocation10 + $0x978] sm:$0xff] }
 0x279   :  { %2802 = vmatpush1.bf16.msra.mxu1 %v3619_v7  ;;  %v837_v7 = vld [vmem:[#allocation10 + $0x818] sm:$0xff] }
 0x27a   :  { %2925 = vmatpush1.bf16.msra.mxu0 %v3621_v8  ;;  %2803 = vmatprep.subr.bf16.mxu1 %v3628_v9  ;;  %v841_v8 = vld [vmem:[#allocation10 + $0x838] sm:$0xff]  ;;  %v3675_v9 = vcombine.low %v828_v4, %v832_v5  ;;  %v884_v4 = vld [vmem:[#allocation10 + $0x990] sm:$0xff] }
 0x27b   :  { %2926 = vmatprep.subr.bf16.mxu0 %v3630_v10  ;;  %v3677_v10 = vcombine.low %v829_v6, %v833_v16  ;;  %v3686_v11 = vcombine.high %v837_v7, %v841_v8  ;;  %v888_v5 = vld [vmem:[#allocation10 + $0x9b0] sm:$0xff]  ;;  %v885_v6 = vld [vmem:[#allocation10 + $0x998] sm:$0xff] }
 0x27c   :  { %v889_v16 = vld [vmem:[#allocation10 + $0x9b8] sm:$0xff] }
 0x27d   :  { %2804 = vmatpush1.bf16.msra.mxu1 %v3627_v36  ;;  %v845_v36 = vld [vmem:[#allocation10 + $0x858] sm:$0xff] }
 0x27e   :  { %2927 = vmatpush1.bf16.msra.mxu0 %v3629_v34  ;;  %2805 = vmatprep.subr.bf16.mxu1 %v3636_v38  ;;  %v849_v34 = vld [vmem:[#allocation10 + $0x878] sm:$0xff]  ;;  %v3683_v38 = vcombine.low %v836_v21, %v840_v22  ;;  %v892_v21 = vld [vmem:[#allocation10 + $0x9d0] sm:$0xff] }
 0x27f   :  { %2928 = vmatprep.subr.bf16.mxu0 %v3638_v13  ;;  %v3685_v13 = vcombine.low %v837_v7, %v841_v8  ;;  %v3694_v1 = vcombine.high %v845_v36, %v849_v34  ;;  %v896_v22 = vld [vmem:[#allocation10 + $0x9f0] sm:$0xff]  ;;  %v893_v7 = vld [vmem:[#allocation10 + $0x9d8] sm:$0xff] }
 0x280   :  { %v897_v8 = vld [vmem:[#allocation10 + $0x9f8] sm:$0xff] }
 0x281   :  { %2806 = vmatpush1.bf16.msra.mxu1 %v3635_v24  ;;  %v853_v24 = vld [vmem:[#allocation10 + $0x898] sm:$0xff] }
 0x282   :  { %2929 = vmatpush1.bf16.msra.mxu0 %v3637_v19  ;;  %2807 = vmatprep.subr.bf16.mxu1 %v3644_v23  ;;  %v857_v19 = vld [vmem:[#allocation10 + $0x8b8] sm:$0xff]  ;;  %v3691_v23 = vcombine.low %v844_v12, %v848_v48  ;;  %v3739_v12 = vcombine.low %v892_v21, %v896_v22  ;;  %v3741_v48 = vcombine.low %v893_v7, %v897_v8 }
 0x283   :  { %2930 = vmatprep.subr.bf16.mxu0 %v3646_v31  ;;  %v3693_v31 = vcombine.low %v845_v36, %v849_v34  ;;  %v3702_v27 = vcombine.high %v853_v24, %v857_v19 }
 0x285   :  { %2808 = vmatpush1.bf16.msra.mxu1 %v3643_v37  ;;  %v861_v37 = vld [vmem:[#allocation10 + $0x8d8] sm:$0xff] }
 0x286   :  { %2931 = vmatpush1.bf16.msra.mxu0 %v3645_v40  ;;  %2809 = vmatprep.subr.bf16.mxu1 %v3652_v41  ;;  %v865_v40 = vld [vmem:[#allocation10 + $0x8f8] sm:$0xff]  ;;  %v3699_v41 = vcombine.low %v852_v60, %v856_v30 }
 0x287   :  { %2932 = vmatprep.subr.bf16.mxu0 %v3654_v42  ;;  %v3708_v42 = vcombine.high %v860_v33, %v864_v35  ;;  %v3710_v43 = vcombine.high %v861_v37, %v865_v40 }
 0x289   :  { %2810 = vmatpush1.bf16.msra.mxu1 %v3651_v49  ;;  %v873_v49 = vld [vmem:[#allocation10 + $0x938] sm:$0xff] }
 0x28a   :  { %2933 = vmatpush1.bf16.msra.mxu0 %v3653_v50  ;;  %2811 = vmatprep.subr.bf16.mxu1 %v3660_v52  ;;  %v3707_v50 = vcombine.low %v860_v33, %v864_v35  ;;  %v3709_v52 = vcombine.low %v861_v37, %v865_v40 }
 0x28b   :  { %2934 = vmatprep.subr.bf16.mxu0 %v3662_v57  ;;  %v3716_v57 = vcombine.high %v868_v44, %v872_v45 }
 0x28d   :  { %2812 = vmatpush1.bf16.msra.mxu1 %v3659_v63  ;;  %v3715_v63 = vcombine.low %v868_v44, %v872_v45 }
 0x28e   :  { %2935 = vmatpush1.bf16.msra.mxu0 %v3661_v2  ;;  %2813 = vmatprep.subr.bf16.mxu1 %v3668_v46  ;;  %v3717_v2 = vcombine.low %v869_v47, %v873_v49  ;;  %v3724_v46 = vcombine.high %v876_v58, %v880_v59 }
 0x28f   :  { %2936 = vmatprep.subr.bf16.mxu0 %v3670_v3  ;;  %v3726_v3 = vcombine.high %v877_v61, %v881_v62 }
 0x291   :  { %2814 = vmatpush1.bf16.msra.mxu1 %v3667_v39  ;;  %v3723_v39 = vcombine.low %v876_v58, %v880_v59 }
 0x292   :  { %2937 = vmatpush1.bf16.msra.mxu0 %v3669_v17  ;;  %2815 = vmatprep.subr.bf16.mxu1 %v3676_v18  ;;  %v3725_v17 = vcombine.low %v877_v61, %v881_v62  ;;  %v3732_v18 = vcombine.high %v884_v4, %v888_v5 }
 0x293   :  { %2938 = vmatprep.subr.bf16.mxu0 %v3678_v20  ;;  %v3734_v20 = vcombine.high %v885_v6, %v889_v16 }
 0x295   :  { %2816 = vmatpush1.bf16.msra.mxu1 %v3675_v9  ;;  %v3731_v9 = vcombine.low %v884_v4, %v888_v5 }
 0x296   :  { %2939 = vmatpush1.bf16.msra.mxu0 %v3677_v10  ;;  %2826 = vmatprep.subr.bf16.mxu1 %v3684_v28  ;;  %v3733_v10 = vcombine.low %v885_v6, %v889_v16  ;;  %v3740_v28 = vcombine.high %v892_v21, %v896_v22 }
 0x297   :  { %2949 = vmatprep.subr.bf16.mxu0 %v3686_v11  ;;  %v3742_v11 = vcombine.high %v893_v7, %v897_v8 }
 0x298   :  { %2818 = vmatmul.mubr.bf16.vlgmr.msra.gmra.mrb[8].mxu1 %v4314_v32 }
 0x299   :  { %2941 = vmatmul.mubr.bf16.vlgmr.msra.gmra.mrb[12].mxu0 %v4314_v32  ;;  %2827 = vmatpush1.bf16.msra.mxu1 %v3683_v38  ;;  %v3701_v32 = vcombine.low %v853_v24, %v857_v19 }
 0x29a   :  { %2950 = vmatpush1.bf16.msra.mxu0 %v3685_v13  ;;  %2828 = vmatprep.subr.bf16.mxu1 %v3692_v14 }
 0x29b   :  { %2951 = vmatprep.subr.bf16.mxu0 %v3694_v1  ;;  %2858 = vmatprep.mubr.bf16.mxu1 %v4049_v0 }
 0x29c   :  { %2981 = vmatprep.mubr.bf16.mxu0 %v4049_v0  ;;  %v3718_v0 = vcombine.high %v869_v47, %v873_v49 }
 0x29d   :  { %2829 = vmatpush1.bf16.msra.mxu1 %v3691_v23 }
 0x29e   :  { %2952 = vmatpush1.bf16.msra.mxu0 %v3693_v31  ;;  %2830 = vmatprep.subr.bf16.mxu1 %v3700_v25 }
 0x29f   :  { %2953 = vmatprep.subr.bf16.mxu0 %v3702_v27 }
 0x2a1   :  { %2831 = vmatpush1.bf16.msra.mxu1 %v3699_v41 }
 0x2a2   :  { %2954 = vmatpush1.bf16.msra.mxu0 %v3701_v32  ;;  %2832 = vmatprep.subr.bf16.mxu1 %v3708_v42 }
 0x2a3   :  { %2955 = vmatprep.subr.bf16.mxu0 %v3710_v43 }
 0x2a5   :  { %2833 = vmatpush1.bf16.msra.mxu1 %v3707_v50 }
 0x2a6   :  { %2956 = vmatpush1.bf16.msra.mxu0 %v3709_v52  ;;  %2834 = vmatprep.subr.bf16.mxu1 %v3716_v57 }
 0x2a7   :  { %2957 = vmatprep.subr.bf16.mxu0 %v3718_v0 }
 0x2a9   :  { %2835 = vmatpush1.bf16.msra.mxu1 %v3715_v63 }
 0x2aa   :  { %2958 = vmatpush1.bf16.msra.mxu0 %v3717_v2  ;;  %2836 = vmatprep.subr.bf16.mxu1 %v3724_v46 }
 0x2ab   :  { %2959 = vmatprep.subr.bf16.mxu0 %v3726_v3 }
 0x2ad   :  { %2837 = vmatpush1.bf16.msra.mxu1 %v3723_v39 }
 0x2ae   :  { %2960 = vmatpush1.bf16.msra.mxu0 %v3725_v17  ;;  %2838 = vmatprep.subr.bf16.mxu1 %v3732_v18 }
 0x2af   :  { %2961 = vmatprep.subr.bf16.mxu0 %v3734_v20 }
 0x2b1   :  { %2839 = vmatpush1.bf16.msra.mxu1 %v3731_v9 }
 0x2b2   :  { %2962 = vmatpush1.bf16.msra.mxu0 %v3733_v10  ;;  %2840 = vmatprep.subr.bf16.mxu1 %v3740_v28 }
 0x2b3   :  { %2963 = vmatprep.subr.bf16.mxu0 %v3742_v11 }
 0x2b5   :  { %2841 = vmatpush1.bf16.msra.mxu1 %v3739_v12 }
 0x2b6   :  { %2964 = vmatpush1.bf16.msra.mxu0 %v3741_v48 }
 0x2b8   :  { %2859 = vmatmul.mubr.bf16.vlgmr.msra.gmra.mrb[8].mxu1 %v4321_v26 }
 0x2b9   :  { %2982 = vmatmul.mubr.bf16.vlgmr.msra.gmra.mrb[12].mxu0 %v4321_v26 }
 0x2eb   :  { %v4337_v36 = vpop.f32.mrb[4].mxu1  ;;  %v4339_v34 = vpop.f32.mrb[8].mxu0 }
 0x2ec   :  { %v2990_v38 = vrot.slane %v4337_v36, 4  ;;  %v3038_v13 = vmul.f32 %v4337_v36, %v4337_v36  ;;  %v3002_v14 = vrot.slane %v4339_v34, 4  ;;  %v3040_v1 = vmul.f32 %v4339_v34, %v4339_v34  ;;  %v4347_v60 = vpop.f32.mrb[5].mxu1  ;;  %v4349_v30 = vpop.f32.mrb[9].mxu0 }
 0x2ed   :  { %v2996_v26 = vrot.slane %v4347_v60, 4  ;;  %v3039_v24 = vmul.f32 %v4347_v60, %v4347_v60  ;;  %v3008_v19 = vrot.slane %v4349_v30, 4  ;;  %v3041_v23 = vmul.f32 %v4349_v30, %v4349_v30  ;;  %v2618_v31 = vpop.f32.mrb[6].mxu1  ;;  %v2741_v25 = vpop.f32.mrb[10].mxu0 }
 0x2ee   :  { %v2991_v27 = vadd.f32 %v2990_v38, %v4337_v36  ;;  %v3046_v33 = vrot.slane %v3038_v13, 4  ;;  %v3003_v35 = vadd.f32 %v3002_v14, %v4339_v34  ;;  %v3058_v37 = vrot.slane %v3040_v1, 4  ;;  %v2619_v40 = vpop.f32.mrb[7].mxu1  ;;  %v2742_v41 = vpop.f32.mrb[11].mxu0 }
 0x2ef   :  { %v2997_v32 = vadd.f32 %v2996_v26, %v4347_v60  ;;  %v3052_v42 = vrot.slane %v3039_v24, 4  ;;  %v3009_v43 = vadd.f32 %v3008_v19, %v4349_v30  ;;  %v3064_v44 = vrot.slane %v3041_v23, 4 }
 0x2f0   :  { %v2992_v45 = vrot.slane %v2991_v27, 2  ;;  %v3047_v47 = vadd.f32 %v3046_v33, %v3038_v13  ;;  %v3004_v49 = vrot.slane %v3003_v35, 2  ;;  %v3059_v50 = vadd.f32 %v3058_v37, %v3040_v1 }
 0x2f1   :  { %v2998_v52 = vrot.slane %v2997_v32, 2  ;;  %v3053_v57 = vadd.f32 %v3052_v42, %v3039_v24  ;;  %v3010_v0 = vrot.slane %v3009_v43, 2  ;;  %v3065_v58 = vadd.f32 %v3064_v44, %v3041_v23 }
 0x2f2   :  { %v2993_v59 = vadd.f32 %v2992_v45, %v2991_v27  ;;  %v3048_v61 = vrot.slane %v3047_v47, 2  ;;  %v3005_v62 = vadd.f32 %v3004_v49, %v3003_v35  ;;  %v3060_v63 = vrot.slane %v3059_v50, 2 }
 0x2f3   :  { %v2999_v2 = vadd.f32 %v2998_v52, %v2997_v32  ;;  %v3054_v46 = vrot.slane %v3053_v57, 2  ;;  %v3011_v3 = vadd.f32 %v3010_v0, %v3009_v43  ;;  %v3066_v4 = vrot.slane %v3065_v58, 2 }
 0x2f4   :  { %v2994_v5 = vrot.slane %v2993_v59, 1  ;;  %v3049_v6 = vadd.f32 %v3048_v61, %v3047_v47  ;;  %v3006_v16 = vrot.slane %v3005_v62, 1  ;;  %v3061_v39 = vadd.f32 %v3060_v63, %v3059_v50 }
 0x2f5   :  { %v3000_v17 = vrot.slane %v2999_v2, 1  ;;  %v3055_v18 = vadd.f32 %v3054_v46, %v3053_v57  ;;  %v3012_v20 = vrot.slane %v3011_v3, 1  ;;  %v3067_v21 = vadd.f32 %v3066_v4, %v3065_v58 }
 0x2f6   :  { %v2995_v22 = vadd.f32 %v2994_v5, %v2993_v59  ;;  %v3050_v7 = vrot.slane %v3049_v6, 1  ;;  %v3007_v8 = vadd.f32 %v3006_v16, %v3005_v62  ;;  %v3062_v9 = vrot.slane %v3061_v39, 1 }
 0x2f7   :  { %v3001_v10 = vadd.f32 %v3000_v17, %v2999_v2  ;;  %v3056_v28 = vrot.slane %v3055_v18, 1  ;;  %v3013_v11 = vadd.f32 %v3012_v20, %v3011_v3  ;;  %v3068_v12 = vrot.slane %v3067_v21, 1 }
 0x2f8   :  { %v3051_v48 = vadd.f32 %v3050_v7, %v3049_v6  ;;  %v4361_v38 = vmul.f32 0.125, %v2995_v22  ;;  %v3063_v13 = vadd.f32 %v3062_v9, %v3061_v39  ;;  %v4363_v14 = vmul.f32 0.125, %v3007_v8 }
 0x2f9   :  { %v3057_v1 = vadd.f32 %v3056_v28, %v3055_v18  ;;  %v4365_v26 = vmul.f32 0.125, %v3001_v10  ;;  %v3069_v24 = vadd.f32 %v3068_v12, %v3067_v21  ;;  %v4367_v19 = vmul.f32 0.125, %v3013_v11 }
 0x2fa   :  { %v3104_v23 = vmul.f32 0.125, %v3051_v48  ;;  %v3112_v31 = vmul.f32 %v4361_v38, %v4361_v38  ;;  %v3106_v25 = vmul.f32 0.125, %v3063_v13  ;;  %v3114_v27 = vmul.f32 %v4363_v14, %v4363_v14 }
 0x2fb   :  { %v3105_v33 = vmul.f32 0.125, %v3057_v1  ;;  %v3113_v35 = vmul.f32 %v4365_v26, %v4365_v26  ;;  %v3107_v37 = vmul.f32 0.125, %v3069_v24  ;;  %v3115_v40 = vmul.f32 %v4367_v19, %v4367_v19 }
 0x2fc   :  { %v3120_v41 = vsub.f32 %v3104_v23, %v3112_v31  ;;  %v3122_v32 = vsub.f32 %v3106_v25, %v3114_v27 }
 0x2fd   :  { %v3121_v42 = vsub.f32 %v3105_v33, %v3113_v35  ;;  %v3123_v43 = vsub.f32 %v3107_v37, %v3115_v40 }
 0x2fe   :  { %v3128_v44 = vmax.f32 %v3120_v41, 0.0  ;;  %v3130_v45 = vmax.f32 %v3122_v32, 0.0 }
 0x2ff   :  { %v3129_v47 = vmax.f32 %v3121_v42, 0.0  ;;  %v3131_v49 = vmax.f32 %v3123_v43, 0.0 }
 0x300   :  { %v3136_v50 = vadd.f32 1e-05, %v3128_v44  ;;  %v3138_v52 = vadd.f32 1e-05, %v3130_v45 }
 0x301   :  { %v3137_v57 = vadd.f32 1e-05, %v3129_v47  ;;  %v3139_v0 = vadd.f32 1e-05, %v3131_v49 }
 0x302   :  { %3836 = vrsqrt.f32 %v3136_v50 }
 0x303   :  { %3838 = vrsqrt.f32 %v3138_v52 }
 0x304   :  { %3840 = vrsqrt.f32 %v3137_v57 }
 0x305   :  { %3842 = vrsqrt.f32 %v3139_v0 }
 0x30c   :  { %v3837_v58 = vpop.eup %3836 }
 0x30d   :  { %v3839_v59 = vpop.eup %3838 }
 0x30e   :  { %v3841_v61 = vpop.eup %3840 }
 0x30f   :  { %v3843_v62 = vpop.eup %3842  ;;  %v3160_v63 = vcombine.low %v3837_v58, %v3841_v61 }
 0x310   :  { %v3161_v2 = vcombine.low %v3839_v59, %v3843_v62 }
 0x311   :  { %v4378_v46 = vrot.slane %v3160_v63, %v4245_v29 }
 0x312   :  { %v4381_v3 = vrot.slane %v3161_v2, %v4245_v29 }
 0x314   :  { %v3192_v4 = vcombine.low %v4378_v46, %v4381_v3 }
 0x38b   :  { %v4385_v5 = vpop.f32.mrb[8].mxu1 }
 0x38c   :  { %v3014_v6 = vrot.slane %v4385_v5, 4  ;;  %v3042_v16 = vmul.f32 %v4385_v5, %v4385_v5  ;;  %v4390_v39 = vpop.f32.mrb[12].mxu0  ;;  %v4392_v17 = vpop.f32.mrb[9].mxu1 }
 0x38d   :  { %v3026_v18 = vrot.slane %v4390_v39, 4  ;;  %v3044_v20 = vmul.f32 %v4390_v39, %v4390_v39  ;;  %v3020_v21 = vrot.slane %v4392_v17, 4  ;;  %v3043_v22 = vmul.f32 %v4392_v17, %v4392_v17  ;;  %v4400_v7 = vpop.f32.mrb[13].mxu0  ;;  %v2864_v8 = vpop.f32.mrb[10].mxu1 }
 0x38e   :  { %v3015_v9 = vadd.f32 %v3014_v6, %v4385_v5  ;;  %v3070_v10 = vrot.slane %v3042_v16, 4  ;;  %v3032_v28 = vrot.slane %v4400_v7, 4  ;;  %v3045_v11 = vmul.f32 %v4400_v7, %v4400_v7  ;;  %v2987_v12 = vpop.f32.mrb[14].mxu0  ;;  %v2865_v48 = vpop.f32.mrb[11].mxu1 }
 0x38f   :  { %v3027_v13 = vadd.f32 %v3026_v18, %v4390_v39  ;;  %v3082_v1 = vrot.slane %v3044_v20, 4  ;;  %v3021_v24 = vadd.f32 %v3020_v21, %v4392_v17  ;;  %v3076_v23 = vrot.slane %v3043_v22, 4  ;;  %v2988_v31 = vpop.f32.mrb[15].mxu0 }
 0x390   :  { %v3016_v25 = vrot.slane %v3015_v9, 2  ;;  %v3071_v27 = vadd.f32 %v3070_v10, %v3042_v16  ;;  %v3033_v33 = vadd.f32 %v3032_v28, %v4400_v7  ;;  %v3088_v35 = vrot.slane %v3045_v11, 4 }
 0x391   :  { %v3028_v37 = vrot.slane %v3027_v13, 2  ;;  %v3083_v40 = vadd.f32 %v3082_v1, %v3044_v20  ;;  %v3022_v41 = vrot.slane %v3021_v24, 2  ;;  %v3077_v32 = vadd.f32 %v3076_v23, %v3043_v22 }
 0x392   :  { %v3017_v42 = vadd.f32 %v3016_v25, %v3015_v9  ;;  %v3072_v43 = vrot.slane %v3071_v27, 2  ;;  %v3034_v44 = vrot.slane %v3033_v33, 2  ;;  %v3089_v45 = vadd.f32 %v3088_v35, %v3045_v11 }
 0x393   :  { %v3029_v47 = vadd.f32 %v3028_v37, %v3027_v13  ;;  %v3084_v49 = vrot.slane %v3083_v40, 2  ;;  %v3023_v50 = vadd.f32 %v3022_v41, %v3021_v24  ;;  %v3078_v52 = vrot.slane %v3077_v32, 2 }
 0x394   :  { %v3018_v57 = vrot.slane %v3017_v42, 1  ;;  %v3073_v0 = vadd.f32 %v3072_v43, %v3071_v27  ;;  %v3035_v58 = vadd.f32 %v3034_v44, %v3033_v33  ;;  %v3090_v59 = vrot.slane %v3089_v45, 2 }
 0x395   :  { %v3030_v61 = vrot.slane %v3029_v47, 1  ;;  %v3085_v62 = vadd.f32 %v3084_v49, %v3083_v40  ;;  %v3024_v63 = vrot.slane %v3023_v50, 1  ;;  %v3079_v2 = vadd.f32 %v3078_v52, %v3077_v32 }
 0x396   :  { %v3019_v6 = vadd.f32 %v3018_v57, %v3017_v42  ;;  %v3074_v16 = vrot.slane %v3073_v0, 1  ;;  %v3036_v18 = vrot.slane %v3035_v58, 1  ;;  %v3091_v20 = vadd.f32 %v3090_v59, %v3089_v45 }
 0x397   :  { %v3031_v21 = vadd.f32 %v3030_v61, %v3029_v47  ;;  %v3086_v22 = vrot.slane %v3085_v62, 1  ;;  %v3025_v8 = vadd.f32 %v3024_v63, %v3023_v50  ;;  %v3080_v9 = vrot.slane %v3079_v2, 1 }
 0x398   :  { %v3075_v10 = vadd.f32 %v3074_v16, %v3073_v0  ;;  %v3100_v28 = vmul.f32 0.125, %v3019_v6  ;;  %v3037_v11 = vadd.f32 %v3036_v18, %v3035_v58  ;;  %v3092_v12 = vrot.slane %v3091_v20, 1 }
 0x399   :  { %v3087_v48 = vadd.f32 %v3086_v22, %v3085_v62  ;;  %v3102_v13 = vmul.f32 0.125, %v3031_v21  ;;  %v3081_v1 = vadd.f32 %v3080_v9, %v3079_v2  ;;  %v3101_v24 = vmul.f32 0.125, %v3025_v8  ;;  %v3094_v9 = vld [vmem:[#allocation11] sm:$0xff] }
 0x39a   :  { %v3108_v23 = vmul.f32 0.125, %v3075_v10  ;;  %v3116_v31 = vmul.f32 %v3100_v28, %v3100_v28  ;;  %v3093_v25 = vadd.f32 %v3092_v12, %v3091_v20  ;;  %v3103_v27 = vmul.f32 0.125, %v3037_v11 }
 0x39b   :  { %v3110_v33 = vmul.f32 0.125, %v3087_v48  ;;  %v3118_v35 = vmul.f32 %v3102_v13, %v3102_v13  ;;  %v3109_v37 = vmul.f32 0.125, %v3081_v1  ;;  %v3117_v40 = vmul.f32 %v3101_v24, %v3101_v24 }
 0x39c   :  { %v3124_v41 = vsub.f32 %v3108_v23, %v3116_v31  ;;  %v3111_v32 = vmul.f32 0.125, %v3093_v25  ;;  %v3119_v42 = vmul.f32 %v3103_v27, %v3103_v27  ;;  %v3200_v22 = vrot.slane %v3192_v4, %v4245_v29 }
 0x39d   :  { %v3126_v43 = vsub.f32 %v3110_v33, %v3118_v35  ;;  %v3125_v44 = vsub.f32 %v3109_v37, %v3117_v40  ;;  %v3234_v11 = vsub.s32 5, %v4242_v15  ;;  %v3238_v12 = vsub.s32 6, %v4242_v15 }
 0x39e   :  { %v3132_v45 = vmax.f32 %v3124_v41, 0.0  ;;  %v3127_v47 = vsub.f32 %v3111_v32, %v3119_v42  ;;  %v3242_v48 = vsub.s32 7, %v4242_v15 }
 0x39f   :  { %v3134_v49 = vmax.f32 %v3126_v43, 0.0  ;;  %v3133_v50 = vmax.f32 %v3125_v44, 0.0 }
 0x3a0   :  { %v3140_v52 = vadd.f32 1e-05, %v3132_v45  ;;  %v3135_v57 = vmax.f32 %v3127_v47, 0.0 }
 0x3a1   :  { %v3142_v0 = vadd.f32 1e-05, %v3134_v49  ;;  %v3141_v58 = vadd.f32 1e-05, %v3133_v50 }
 0x3a2   :  { %3844 = vrsqrt.f32 %v3140_v52  ;;  %v3143_v59 = vadd.f32 1e-05, %v3135_v57 }
 0x3a3   :  { %3846 = vrsqrt.f32 %v3142_v0 }
 0x3a4   :  { %3848 = vrsqrt.f32 %v3141_v58 }
 0x3a5   :  { %3850 = vrsqrt.f32 %v3143_v59  ;;  %v3095_v59 = vld [vmem:[#allocation13] sm:$0xff] }
 0x3ac   :  { %v3845_v61 = vpop.eup %3844 }
 0x3ad   :  { %v3847_v62 = vpop.eup %3846 }
 0x3ae   :  { %v3849_v63 = vpop.eup %3848 }
 0x3af   :  { %v3851_v2 = vpop.eup %3850  ;;  %v3162_v6 = vcombine.low %v3845_v61, %v3849_v63 }
 0x3b0   :  { %v3163_v16 = vcombine.low %v3847_v62, %v3851_v2 }
 0x3b1   :  { %v3184_v18 = vrot.slane %v3162_v6, %v4245_v29 }
 0x3b2   :  { %v3191_v20 = vrot.slane %v3163_v16, %v4245_v29 }
 0x3b4   :  { %v3193_v21 = vcombine.low %v3184_v18, %v3191_v20 }
 0x3b6   :  { %v3207_v8 = vrot.slane %v3193_v21, %v4245_v29 }
 0x3b8   :  { %v3208_v10 = vcombine.low %v3200_v22, %v3207_v8 }
 0x3ba   :  { %v3210_v1 = vmul.f32 %v3208_v10, %v3094_v9 }
 0x3bc   :  { %v3215_v23 = vrot.slane %v3210_v1, %v4253_v51  ;;  %v3219_v31 = vrot.slane %v3210_v1, %v4256_v53  ;;  %v3223_v25 = vrot.slane %v3210_v1, %v4259_v54  ;;  %v3227_v46 = vrot.slane %v3210_v1, %v4262_v55 }
 0x3bd   :  { %v3231_v3 = vrot.slane %v3210_v1, %v4265_v56  ;;  %v3235_v4 = vrot.slane %v3210_v1, %v3234_v11  ;;  %v3239_v33 = vrot.slane %v3210_v1, %v3238_v12  ;;  %v3243_v35 = vrot.slane %v3210_v1, %v3242_v48 }
 0x3be   :  { %v3252_v37 = vmul.f32 %v3215_v23, %v4361_v38  ;;  %v3253_v40 = vmul.f32 %v3219_v31, %v4365_v26  ;;  %v3254_v15 = vmul.f32 %v3223_v25, %v4363_v14  ;;  %v3255_v41 = vmul.f32 %v3227_v46, %v4367_v19 }
 0x3bf   :  { %v3256_v32 = vmul.f32 %v3231_v3, %v3100_v28  ;;  %v3257_v42 = vmul.f32 %v3235_v4, %v3101_v24  ;;  %v3258_v43 = vmul.f32 %v3239_v33, %v3102_v13  ;;  %v3259_v44 = vmul.f32 %v3243_v35, %v3103_v27 }
 0x3c0   :  { %v3268_v45 = vcombine.low %v3252_v37, %v3253_v40  ;;  %v3269_v47 = vcombine.low %v3254_v15, %v3255_v41  ;;  %v3323_v49 = vmul.f32 %v3231_v3, %v4385_v5  ;;  %v3324_v50 = vmul.f32 %v3235_v4, %v4392_v17 }
 0x3c1   :  { %v3270_v52 = vcombine.low %v3256_v32, %v3257_v42  ;;  %v3271_v57 = vcombine.low %v3258_v43, %v3259_v44  ;;  %v3325_v38 = vmul.f32 %v3239_v33, %v4390_v39  ;;  %v3326_v26 = vmul.f32 %v3243_v35, %v4400_v7 }
 0x3c2   :  { %v3278_v14 = vrot.slane %v3268_v45, %v4245_v29  ;;  %v3285_v19 = vrot.slane %v3269_v47, %v4245_v29  ;;  %v3319_v28 = vmul.f32 %v3215_v23, %v4337_v36  ;;  %v3320_v13 = vmul.f32 %v3219_v31, %v4347_v60 }
 0x3c3   :  { %v3292_v24 = vrot.slane %v3270_v52, %v4245_v29  ;;  %v3299_v5 = vrot.slane %v3271_v57, %v4245_v29  ;;  %v3321_v17 = vmul.f32 %v3223_v25, %v4339_v34  ;;  %v3322_v27 = vmul.f32 %v3227_v46, %v4349_v30 }
 0x3c4   :  { %v3300_v0 = vcombine.low %v3278_v14, %v3285_v19 }
 0x3c5   :  { %v3301_v39 = vcombine.low %v3292_v24, %v3299_v5 }
 0x3c6   :  { %v3308_v7 = vrot.slane %v3300_v0, %v4245_v29 }
 0x3c7   :  { %v3315_v58 = vrot.slane %v3301_v39, %v4245_v29 }
 0x3c9   :  { %v3316_v61 = vcombine.low %v3308_v7, %v3315_v58 }
 0x3cb   :  { %v3318_v62 = vsub.f32 %v3095_v59, %v3316_v61 }
 0x3cd   :  { %v3351_v36 = vrot.slane %v3318_v62, %v3234_v11  ;;  %v3355_v63 = vrot.slane %v3318_v62, %v3238_v12  ;;  %v3359_v60 = vrot.slane %v3318_v62, %v3242_v48  ;;  %v3331_v2 = vrot.slane %v3318_v62, %v4253_v51 }
 0x3ce   :  { %v3335_v6 = vrot.slane %v3318_v62, %v4256_v53  ;;  %v3339_v34 = vrot.slane %v3318_v62, %v4259_v54  ;;  %v3343_v30 = vrot.slane %v3318_v62, %v4262_v55  ;;  %v3347_v16 = vrot.slane %v3318_v62, %v4265_v56 }
 0x3cf   :  { %v3374_v18 = vadd.f32 %v3355_v63, %v3325_v38  ;;  %v3375_v20 = vadd.f32 %v3359_v60, %v3326_v26  ;;  %v3368_v21 = vadd.f32 %v3331_v2, %v3319_v28  ;;  %v3373_v29 = vadd.f32 %v3351_v36, %v3324_v50 }
 0x3d0   :  { %v3369_v22 = vadd.f32 %v3335_v6, %v3320_v13  ;;  %v3370_v8 = vadd.f32 %v3339_v34, %v3321_v17  ;;  %v3371_v9 = vadd.f32 %v3343_v30, %v3322_v27  ;;  %v3372_v10 = vadd.f32 %v3347_v16, %v3323_v49 }
 0x3d1   :  { %v3382_v11 = vmax.f32 %v3374_v18, 0.0  ;;  %v3383_v51 = vmax.f32 %v3375_v20, 0.0  ;;  %v3376_v12 = vmax.f32 %v3368_v21, 0.0  ;;  %v3381_v53 = vmax.f32 %v3373_v29, 0.0 }
 0x3d2   :  { %v3377_v48 = vmax.f32 %v3369_v22, 0.0  ;;  %v3378_v54 = vmax.f32 %v3370_v8, 0.0  ;;  %v3379_v1 = vmax.f32 %v3371_v9, 0.0  ;;  %v3380_v55 = vmax.f32 %v3372_v10, 0.0 }
 0x3d3   :  { %3390 = vst [vmem:[#allocation14 + $0x30] sm:$0xff] %v3382_v11  ;;  %3391 = vst [vmem:[#allocation14 + $0x38] sm:$0xff] %v3383_v51 }
 0x3d4   :  { %3384 = vst [vmem:[#allocation14] sm:$0xff] %v3376_v12  ;;  %3389 = vst [vmem:[#allocation14 + $0x28] sm:$0xff] %v3381_v53 }
 0x3d5   :  { %3385 = vst [vmem:[#allocation14 + $0x8] sm:$0xff] %v3377_v48  ;;  %3386 = vst [vmem:[#allocation14 + $0x10] sm:$0xff] %v3378_v54 }
 0x3d6   :  { %3387 = vst [vmem:[#allocation14 + $0x18] sm:$0xff] %v3379_v1  ;;  %3388 = vst [vmem:[#allocation14 + $0x20] sm:$0xff] %v3380_v55 }
 0x3d7   :  { %4017 = shalt.err (!%p4014_p4)
}
 0x3d8   :  { %s4018_s14 = scalar_lea.hbm %s4466_s7, 1024 }
 0x3d9   :  { %p4019_p5 = scmp.ne.s32.totalorder %s4466_s7, %s4018_s14  ;;  %p4022_p6 = scmp.lt.u32.totalorder %s4018_s14, %s4466_s7 }
 0x3db   :  { %p4024_p7 = pnand %p4022_p6, %p4019_p5 }
 0x3dd   :  { %4027 = shalt.err (!%p4024_p7)
}
 0x3de   :  { %3401 = dma.vmem_to_hbm [thread:$0]  %s3399_s12, 1024, %s4466_s7, [#allocation4]  }
 0x3df   :  { %4036 = dma.done.wait [#allocation4], 1024  }
 0x3e0   :  { %4037 = vsyncadd [#allocation4], 4294966272 }
 0x3e1   :  { %3405 = vsyncpa [#allocation3], 1 }
 0x3e2   :  { %3406 = vsyncpa [#allocation6], 1 }
 0x3e3   :  { %3407 = vsyncpa [#allocation9], 1 }
 0x3e4   :  { %3408 = vsyncpa [#allocation12], 1 }
 0x3e5   :  { %3409 = vsyncpa [#allocation4], 1 }

</bundles_post_ra>
